<compile_context>
chip_gen: v7x
topology: tpu7x:2x2x1
jax: 0.10.0
libtpu: 0.0.40
codegen_flags: <defaults>
</compile_context>

<pallas_src>
import functools

import jax
import jax.numpy as jnp
from jax.experimental import pallas as pl
from jax.experimental.pallas import tpu as pltpu


STREAM_H = 128          # width of the value / advantage hidden layers (module spec)
HEAD_PAD = 128          # lane-dense width of the fused head GEMM output
DEFAULT_MAX_TILE = 512  # batch rows per grid step (sweepable, multiple of 8)


# ----------------------------------------------------------------------------
# Pallas kernel: full Dueling-DQN forward for one batch tile.
# ----------------------------------------------------------------------------
def dueling_dqn_kernel(
    x_ref,                   # (TB, S)              f32
    w1_ref, b1_ref,          # (S, H0) f32,         (1, H0) f32   (first GEMM stays f32)
    w2_ref, b2_ref,          # (H0, H1) bf16,       (1, H1) f32
    wh_ref, bh_ref,          # fused [wv1|wa1]: (H1, 256) bf16, (1, 256) f32
    whd_ref, bhd_ref,        # fused block-diag head: (256, HEAD_PAD) bf16, (1, HEAD_PAD) f32
    q_ref,                   # (TB, A)              f32
    *,
    num_actions,
):
    f32 = jnp.float32
    bf16 = jnp.bfloat16
    A = num_actions

    x = x_ref[...]

    # Feature layers: Linear -> ReLU -> (Dropout=identity) -> Linear -> ReLU.
    # First GEMM kept f32 (K=32 is negligible work; preserves state dynamic range).
    h1 = jnp.dot(x, w1_ref[...], preferred_element_type=f32) + b1_ref[...]
    h1 = jnp.maximum(h1, 0.0)
    h2 = jnp.dot(h1.astype(bf16), w2_ref[...], preferred_element_type=f32) + b2_ref[...]
    h2 = jnp.maximum(h2, 0.0)

    # Fused value/advantage stream hidden layers: one (H1, 256) GEMM.
    h3 = jnp.dot(h2.astype(bf16), wh_ref[...], preferred_element_type=f32) + bh_ref[...]
    h3 = jnp.maximum(h3, 0.0)

    # Fused block-diagonal head (K=256, N=128, lane-dense MXU result):
    #   cols 0..A-1 : advantage head (weights live in rows STREAM_H..2*STREAM_H-1)
    #   cols A..126 : exactly zero (zero weights + zero bias)
    #   col  127    : value head    (weights live in rows 0..STREAM_H-1)
    head = jnp.dot(h3.astype(bf16), whd_ref[...], preferred_element_type=f32) + bhd_ref[...]

    value = head[:, HEAD_PAD - 1:HEAD_PAD]            # (TB, 1)
    adv = head[:, :A]                                 # (TB, A), lane-aligned at 0
    # Pad columns are exactly zero, so full-lane sum minus the value column
    # equals the sum over the A real advantage columns.
    adv_mean = (jnp.sum(head, axis=-1, keepdims=True) - value) * (1.0 / A)

    # Dueling combination: q = V + A - mean_A(A)
    q_ref[...] = value + adv - adv_mean


# ----------------------------------------------------------------------------
# Wrapper: 1-D grid over batch tiles; weights VMEM-resident via constant maps.
# ----------------------------------------------------------------------------
def _choose_batch_tile(batch, max_tile=DEFAULT_MAX_TILE):
    """Big tiles (few grid steps), but >= 2 tiles when possible so v7x's two
    TensorCores both get work; tile is a multiple of 8 (sublane) or == batch."""
    if batch <= 8:
        return batch                       # single tile equal to the full dim
    half = -(-batch // 2)                  # ceil(batch / 2)
    half = -(-half // 8) * 8               # round up to a multiple of 8
    return min(max_tile, half)


def dueling_dqn_forward(x, kp, action_size, *, max_batch_tile=DEFAULT_MAX_TILE):
    B, S = x.shape
    H0 = kp["w1"].shape[1]
    H1 = kp["w2"].shape[1]

    batch_tile = _choose_batch_tile(B, max_batch_tile)
    num_tiles = pl.cdiv(B, batch_tile)     # partial last tile handled by Pallas

    batch_map = lambda i: (i, 0)
    const_map = lambda i: (0, 0)

    in_specs = [
        pl.BlockSpec((batch_tile, S), batch_map),   # x: tiled over batch
        pl.BlockSpec(kp["w1"].shape, const_map),    # weights/biases: constant
        pl.BlockSpec(kp["b1"].shape, const_map),    # index maps -> stay resident
        pl.BlockSpec(kp["w2"].shape, const_map),    # in VMEM across all tiles
        pl.BlockSpec(kp["b2"].shape, const_map),
        pl.BlockSpec(kp["w_h"].shape, const_map),
        pl.BlockSpec(kp["b_h"].shape, const_map),
        pl.BlockSpec(kp["w_head"].shape, const_map),
        pl.BlockSpec(kp["b_head"].shape, const_map),
    ]
    out_specs = pl.BlockSpec((batch_tile, action_size), batch_map)

    # Advisory cost estimate for XLA's scheduler.
    flops = 2 * B * (S * H0 + H0 * H1 + H1 * 2 * STREAM_H + 2 * STREAM_H * HEAD_PAD)
    weight_bytes = sum(int(v.size) * v.dtype.itemsize for v in kp.values())
    bytes_accessed = int(x.size) * 4 + weight_bytes + B * action_size * 4
    cost = pl.CostEstimate(flops=int(flops), transcendentals=0,
                           bytes_accessed=int(bytes_accessed))

    kernel = functools.partial(dueling_dqn_kernel, num_actions=int(action_size))

    return pl.pallas_call(
        kernel,
        out_shape=jax.ShapeDtypeStruct((B, action_size), jnp.float32),
        grid=(num_tiles,),
        in_specs=in_specs,
        out_specs=out_specs,
        compiler_params=pltpu.CompilerParams(
            dimension_semantics=("parallel",),       # shards batch tiles on v7x
            vmem_limit_bytes=32 * 1024 * 1024),      # lets v5e match v6e/v7x tiles
        cost_estimate=cost,
    )(
        x,
        kp["w1"], kp["b1"],
        kp["w2"], kp["b2"],
        kp["w_h"], kp["b_h"],
        kp["w_head"], kp["b_head"],
    )


# ----------------------------------------------------------------------------
# Parameter init (Xavier-uniform weights, bias = 0.01), matching
# DuelingDQN._init_weights.  Master weights are f32, stored (in, out).
# ----------------------------------------------------------------------------
def init_params(key, state_size, action_size, hidden_sizes=(512, 256)):
    h0, h1 = hidden_sizes

    def xavier(k, fan_in, fan_out):
        bound = jnp.sqrt(6.0 / (fan_in + fan_out))
        return jax.random.uniform(
            k, (fan_in, fan_out), dtype=jnp.float32, minval=-bound, maxval=bound
        )

    def bias(fan_out):
        return jnp.full((1, fan_out), 0.01, dtype=jnp.float32)

    keys = jax.random.split(key, 6)
    return {
        "w1": xavier(keys[0], state_size, h0),          "b1": bias(h0),
        "w2": xavier(keys[1], h0, h1),                  "b2": bias(h1),
        "wv1": xavier(keys[2], h1, STREAM_H),           "bv1": bias(STREAM_H),
        "wv2": xavier(keys[3], STREAM_H, 1),            "bv2": bias(1),
        "wa1": xavier(keys[4], h1, STREAM_H),           "ba1": bias(STREAM_H),
        "wa2": xavier(keys[5], STREAM_H, action_size),  "ba2": bias(action_size),
    }


# ----------------------------------------------------------------------------
# Kernel-side parameter packing: bf16 weights (except layer 1), fused streams,
# fused block-diagonal value+advantage head.
# ----------------------------------------------------------------------------
def prepare_kernel_params(p, action_size):
    bf16 = jnp.bfloat16
    A = action_size
    assert A <= HEAD_PAD - 1, "action_size must be <= 127 for the fused head"

    # Fused value/advantage stream hidden layers: one (H1, 256) GEMM.
    w_h = jnp.concatenate([p["wv1"], p["wa1"]], axis=1)          # (H1, 256)
    b_h = jnp.concatenate([p["bv1"], p["ba1"]], axis=1)          # (1, 256)

    # Fused block-diagonal head: rows 0..127 (value hidden) feed only the last
    # column; rows 128..255 (advantage hidden) feed columns 0..A-1; every other
    # column is exactly zero (needed for the adv-mean trick in the kernel).
    w_head = jnp.zeros((2 * STREAM_H, HEAD_PAD), jnp.float32)
    w_head = w_head.at[STREAM_H:, :A].set(p["wa2"])
    w_head = w_head.at[:STREAM_H, HEAD_PAD - 1:HEAD_PAD].set(p["wv2"])
    b_head = jnp.zeros((1, HEAD_PAD), jnp.float32)
    b_head = b_head.at[:, :A].set(p["ba2"])
    b_head = b_head.at[:, HEAD_PAD - 1:].set(p["bv2"])

    return {
        "w1": p["w1"],                   "b1": p["b1"],   # first GEMM stays f32
        "w2": p["w2"].astype(bf16),      "b2": p["b2"],
        "w_h": w_h.astype(bf16),         "b_h": b_h,
        "w_head": w_head.astype(bf16),   "b_head": b_head,
    }


# ----------------------------------------------------------------------------
# References for correctness checks.
# ----------------------------------------------------------------------------
def reference_forward_mixed(x, kp, action_size):
    """Mirrors the kernel math exactly (f32 first GEMM, bf16 operands after)."""
    f32, bf16 = jnp.float32, jnp.bfloat16
    mm = lambda a, w: jnp.dot(a.astype(bf16), w, preferred_element_type=f32)

    h1 = jnp.maximum(jnp.dot(x, kp["w1"], preferred_element_type=f32) + kp["b1"], 0.0)
    h2 = jnp.maximum(mm(h1, kp["w2"]) + kp["b2"], 0.0)
    h3 = jnp.maximum(mm(h2, kp["w_h"]) + kp["b_h"], 0.0)
    head = mm(h3, kp["w_head"]) + kp["b_head"]
    value = head[:, HEAD_PAD - 1:]
    adv = head[:, :action_size]
    return value + adv - jnp.mean(adv, axis=1, keepdims=True)


def reference_forward_f32(x, p):
    """Pure f32 reference matching the PyTorch module semantics."""
    h1 = jnp.maximum(x @ p["w1"] + p["b1"], 0.0)
    h2 = jnp.maximum(h1 @ p["w2"] + p["b2"], 0.0)
    vh = jnp.maximum(h2 @ p["wv1"] + p["bv1"], 0.0)
    value = vh @ p["wv2"] + p["bv2"]
    ah = jnp.maximum(h2 @ p["wa1"] + p["ba1"], 0.0)
    adv = ah @ p["wa2"] + p["ba2"]
    return value + adv - jnp.mean(adv, axis=1, keepdims=True)


if __name__ == "__main__":
    # Small, module-consistent shapes: flat state vector in, Q-values out.
    # batch=200 exercises a 2-step grid (two 104-row tiles, last one partial).
    batch = 200
    state_size = 32
    action_size = 8
    hidden_sizes = (512, 256)   # module defaults

    key = jax.random.PRNGKey(0)
    k_params, k_x = jax.random.split(key)
    master = init_params(k_params, state_size, action_size, hidden_sizes)
    kparams = prepare_kernel_params(master, action_size)
    x = jax.random.normal(k_x, (batch, state_size), dtype=jnp.float32)

    q = dueling_dqn_forward(x, kparams, action_size)
    q = jax.block_until_ready(q)
    assert q.shape == (batch, action_size)

    # Exact-path check (same f32/bf16 mixed precision as the kernel).
    q_mixed_ref = reference_forward_mixed(x, kparams, action_size)
    assert jnp.allclose(q, q_mixed_ref, atol=2e-3, rtol=2e-3), \
        float(jnp.max(jnp.abs(q - q_mixed_ref)))

    # Module-semantics check against the full-f32 reference (loose tolerance
    # accounts only for bf16 rounding in layers 2+).
    q_f32_ref = reference_forward_f32(x, master)
    assert jnp.allclose(q, q_f32_ref, atol=5e-2, rtol=5e-2), \
        float(jnp.max(jnp.abs(q - q_f32_ref)))

    # TODO(synk): nn.Dropout(0.1) is treated as identity (eval mode); add
    # pltpu.prng_random_bits-based masks if training-mode dropout is needed.
    print("KERNEL_OK")
</pallas_src>

<mosaic_0001>
module attributes {stable_mosaic.version = 11 : i64} {
  func.func @dueling_dqn_kernel(%arg0: i32, %arg1: memref<104x32xf32, #tpu.memory_space<vmem>>, %arg2: memref<32x512xf32, #tpu.memory_space<vmem>>, %arg3: memref<1x512xf32, #tpu.memory_space<vmem>>, %arg4: memref<512x256xbf16, #tpu.memory_space<vmem>>, %arg5: memref<1x256xf32, #tpu.memory_space<vmem>>, %arg6: memref<256x256xbf16, #tpu.memory_space<vmem>>, %arg7: memref<1x256xf32, #tpu.memory_space<vmem>>, %arg8: memref<256x128xbf16, #tpu.memory_space<vmem>>, %arg9: memref<1x128xf32, #tpu.memory_space<vmem>>, %arg10: memref<104x8xf32, #tpu.memory_space<vmem>>) attributes {dimension_semantics = [#tpu.dimension_semantics<parallel>], iteration_bounds = array<i64: 2>, scalar_prefetch = 0 : i64, scratch_operands = 0 : i64, tpu.core_type = #tpu.core_type<tc>, window_params = [{transform_indices = @transform_0, window_bounds = array<i64: 104, 32>}, {pipeline_mode = #tpu.pipeline_mode<synchronous>, transform_indices = @transform_1, window_bounds = array<i64: 32, 512>}, {pipeline_mode = #tpu.pipeline_mode<synchronous>, transform_indices = @transform_2, window_bounds = array<i64: 1, 512>}, {pipeline_mode = #tpu.pipeline_mode<synchronous>, transform_indices = @transform_3, window_bounds = array<i64: 512, 256>}, {pipeline_mode = #tpu.pipeline_mode<synchronous>, transform_indices = @transform_4, window_bounds = array<i64: 1, 256>}, {pipeline_mode = #tpu.pipeline_mode<synchronous>, transform_indices = @transform_5, window_bounds = array<i64: 256, 256>}, {pipeline_mode = #tpu.pipeline_mode<synchronous>, transform_indices = @transform_6, window_bounds = array<i64: 1, 256>}, {pipeline_mode = #tpu.pipeline_mode<synchronous>, transform_indices = @transform_7, window_bounds = array<i64: 256, 128>}, {pipeline_mode = #tpu.pipeline_mode<synchronous>, transform_indices = @transform_8, window_bounds = array<i64: 1, 128>}, {transform_indices = @transform_9, window_bounds = array<i64: 104, 8>}]} {
    %c0 = arith.constant 0 : index
    %c0_0 = arith.constant 0 : index
    %0 = vector.load %arg1[%c0, %c0_0] : memref<104x32xf32, #tpu.memory_space<vmem>>, vector<104x32xf32>
    %c0_1 = arith.constant 0 : index
    %c0_2 = arith.constant 0 : index
    %1 = vector.load %arg2[%c0_1, %c0_2] : memref<32x512xf32, #tpu.memory_space<vmem>>, vector<32x512xf32>
    %cst = arith.constant dense<0.000000e+00> : vector<104x512xf32>
    %2 = tpu.matmul %0, %1, %cst {dimension_numbers = #tpu.dot_dimension_numbers<[1], [0], [0], [1], [0, 0, 1, 1], [], []>} : vector<104x32xf32>, vector<32x512xf32>, vector<104x512xf32> -> vector<104x512xf32>
    %c0_3 = arith.constant 0 : index
    %c0_4 = arith.constant 0 : index
    %3 = vector.load %arg3[%c0_3, %c0_4] : memref<1x512xf32, #tpu.memory_space<vmem>>, vector<1x512xf32>
    %4 = vector.broadcast %3 : vector<1x512xf32> to vector<104x512xf32>
    %5 = arith.addf %2, %4 : vector<104x512xf32>
    %cst_5 = arith.constant 0.000000e+00 : f32
    %6 = vector.broadcast %cst_5 : f32 to vector<104x512xf32>
    %7 = arith.maximumf %5, %6 : vector<104x512xf32>
    %8 = arith.truncf %7 : vector<104x512xf32> to vector<104x512xbf16>
    %c0_6 = arith.constant 0 : index
    %c0_7 = arith.constant 0 : index
    %9 = vector.load %arg4[%c0_6, %c0_7] : memref<512x256xbf16, #tpu.memory_space<vmem>>, vector<512x256xbf16>
    %cst_8 = arith.constant dense<0.000000e+00> : vector<104x256xf32>
    %10 = tpu.matmul %8, %9, %cst_8 {dimension_numbers = #tpu.dot_dimension_numbers<[1], [0], [0], [1], [0, 0, 1, 1], [], []>} : vector<104x512xbf16>, vector<512x256xbf16>, vector<104x256xf32> -> vector<104x256xf32>
    %c0_9 = arith.constant 0 : index
    %c0_10 = arith.constant 0 : index
    %11 = vector.load %arg5[%c0_9, %c0_10] : memref<1x256xf32, #tpu.memory_space<vmem>>, vector<1x256xf32>
    %12 = vector.broadcast %11 : vector<1x256xf32> to vector<104x256xf32>
    %13 = arith.addf %10, %12 : vector<104x256xf32>
    %cst_11 = arith.constant 0.000000e+00 : f32
    %14 = vector.broadcast %cst_11 : f32 to vector<104x256xf32>
    %15 = arith.maximumf %13, %14 : vector<104x256xf32>
    %16 = arith.truncf %15 : vector<104x256xf32> to vector<104x256xbf16>
    %c0_12 = arith.constant 0 : index
    %c0_13 = arith.constant 0 : index
    %17 = vector.load %arg6[%c0_12, %c0_13] : memref<256x256xbf16, #tpu.memory_space<vmem>>, vector<256x256xbf16>
    %cst_14 = arith.constant dense<0.000000e+00> : vector<104x256xf32>
    %18 = tpu.matmul %16, %17, %cst_14 {dimension_numbers = #tpu.dot_dimension_numbers<[1], [0], [0], [1], [0, 0, 1, 1], [], []>} : vector<104x256xbf16>, vector<256x256xbf16>, vector<104x256xf32> -> vector<104x256xf32>
    %c0_15 = arith.constant 0 : index
    %c0_16 = arith.constant 0 : index
    %19 = vector.load %arg7[%c0_15, %c0_16] : memref<1x256xf32, #tpu.memory_space<vmem>>, vector<1x256xf32>
    %20 = vector.broadcast %19 : vector<1x256xf32> to vector<104x256xf32>
    %21 = arith.addf %18, %20 : vector<104x256xf32>
    %cst_17 = arith.constant 0.000000e+00 : f32
    %22 = vector.broadcast %cst_17 : f32 to vector<104x256xf32>
    %23 = arith.maximumf %21, %22 : vector<104x256xf32>
    %24 = arith.truncf %23 : vector<104x256xf32> to vector<104x256xbf16>
    %c0_18 = arith.constant 0 : index
    %c0_19 = arith.constant 0 : index
    %25 = vector.load %arg8[%c0_18, %c0_19] : memref<256x128xbf16, #tpu.memory_space<vmem>>, vector<256x128xbf16>
    %cst_20 = arith.constant dense<0.000000e+00> : vector<104x128xf32>
    %26 = tpu.matmul %24, %25, %cst_20 {dimension_numbers = #tpu.dot_dimension_numbers<[1], [0], [0], [1], [0, 0, 1, 1], [], []>} : vector<104x256xbf16>, vector<256x128xbf16>, vector<104x128xf32> -> vector<104x128xf32>
    %c0_21 = arith.constant 0 : index
    %c0_22 = arith.constant 0 : index
    %27 = vector.load %arg9[%c0_21, %c0_22] : memref<1x128xf32, #tpu.memory_space<vmem>>, vector<1x128xf32>
    %28 = vector.broadcast %27 : vector<1x128xf32> to vector<104x128xf32>
    %29 = arith.addf %26, %28 : vector<104x128xf32>
    %30 = vector.extract_strided_slice %29 {offsets = [0, 127], sizes = [104, 1], strides = [1, 1]} : vector<104x128xf32> to vector<104x1xf32>
    %31 = vector.extract_strided_slice %29 {offsets = [0, 0], sizes = [104, 8], strides = [1, 1]} : vector<104x128xf32> to vector<104x8xf32>
    %cst_23 = arith.constant dense<0.000000e+00> : vector<104xf32>
    %32 = vector.multi_reduction <add>, %29, %cst_23 [1] : vector<104x128xf32> to vector<104xf32>
    %33 = vector.shape_cast %32 : vector<104xf32> to vector<104x1xf32>
    %34 = arith.subf %33, %30 : vector<104x1xf32>
    %cst_24 = arith.constant 1.250000e-01 : f32
    %35 = vector.broadcast %cst_24 : f32 to vector<104x1xf32>
    %36 = arith.mulf %34, %35 : vector<104x1xf32>
    %37 = vector.broadcast %30 : vector<104x1xf32> to vector<104x8xf32>
    %38 = arith.addf %37, %31 : vector<104x8xf32>
    %39 = vector.broadcast %36 : vector<104x1xf32> to vector<104x8xf32>
    %40 = arith.subf %38, %39 : vector<104x8xf32>
    %c0_25 = arith.constant 0 : index
    %c0_26 = arith.constant 0 : index
    %41 = vector.load %arg10[%c0_25, %c0_26] : memref<104x8xf32, #tpu.memory_space<vmem>>, vector<104x8xf32>
    tpu.vector_store %arg10[%c0_25, %c0_26], %40 {strides = array<i32>} : memref<104x8xf32, #tpu.memory_space<vmem>>, vector<104x8xf32>,
    return
  }
  func.func @transform_0(%arg0: i32) -> (i32, i32) {
    %c0_i32 = arith.constant 0 : i32
    %c0_i32_0 = arith.constant 0 : i32
    return %arg0, %c0_i32 : i32, i32
  }
  func.func @transform_1(%arg0: i32) -> (i32, i32) {
    %c0_i32 = arith.constant 0 : i32
    %c0_i32_0 = arith.constant 0 : i32
    %c0_i32_1 = arith.constant 0 : i32
    return %c0_i32, %c0_i32_0 : i32, i32
  }
  func.func @transform_2(%arg0: i32) -> (i32, i32) {
    %c0_i32 = arith.constant 0 : i32
    %c0_i32_0 = arith.constant 0 : i32
    %c0_i32_1 = arith.constant 0 : i32
    return %c0_i32, %c0_i32_0 : i32, i32
  }
  func.func @transform_3(%arg0: i32) -> (i32, i32) {
    %c0_i32 = arith.constant 0 : i32
    %c0_i32_0 = arith.constant 0 : i32
    %c0_i32_1 = arith.constant 0 : i32
    return %c0_i32, %c0_i32_0 : i32, i32
  }
  func.func @transform_4(%arg0: i32) -> (i32, i32) {
    %c0_i32 = arith.constant 0 : i32
    %c0_i32_0 = arith.constant 0 : i32
    %c0_i32_1 = arith.constant 0 : i32
    return %c0_i32, %c0_i32_0 : i32, i32
  }
  func.func @transform_5(%arg0: i32) -> (i32, i32) {
    %c0_i32 = arith.constant 0 : i32
    %c0_i32_0 = arith.constant 0 : i32
    %c0_i32_1 = arith.constant 0 : i32
    return %c0_i32, %c0_i32_0 : i32, i32
  }
  func.func @transform_6(%arg0: i32) -> (i32, i32) {
    %c0_i32 = arith.constant 0 : i32
    %c0_i32_0 = arith.constant 0 : i32
    %c0_i32_1 = arith.constant 0 : i32
    return %c0_i32, %c0_i32_0 : i32, i32
  }
  func.func @transform_7(%arg0: i32) -> (i32, i32) {
    %c0_i32 = arith.constant 0 : i32
    %c0_i32_0 = arith.constant 0 : i32
    %c0_i32_1 = arith.constant 0 : i32
    return %c0_i32, %c0_i32_0 : i32, i32
  }
  func.func @transform_8(%arg0: i32) -> (i32, i32) {
    %c0_i32 = arith.constant 0 : i32
    %c0_i32_0 = arith.constant 0 : i32
    %c0_i32_1 = arith.constant 0 : i32
    return %c0_i32, %c0_i32_0 : i32, i32
  }
  func.func @transform_9(%arg0: i32) -> (i32, i32) {
    %c0_i32 = arith.constant 0 : i32
    %c0_i32_0 = arith.constant 0 : i32
    return %arg0, %c0_i32 : i32, i32
  }
}

</mosaic_0001>

<bundles_post_ra>
// kernel: tpu_custom_call.1
= control target key start
LH: loop header
LB: loop body
LE: loop exit
PB: predicated region body
PF: predicated region fallthrough
CT: control target
= control target key end

     0   :  { %s4077_s0 = inlined_call_operand.vmem [shape: f32[200,32], index: 0, kind: input, shape index: {}]   ;;  %s4078_s1 = inlined_call_operand.hbm [shape: f32[32,512], index: 1, kind: input, shape index: {}]   ;;  %s4079_s2 = inlined_call_operand.vmem [shape: f32[1,512], index: 2, kind: input, shape index: {}]   ;;  %s4080_s3 = inlined_call_operand.hbm [shape: bf16[512,256], index: 3, kind: input, shape index: {}]   ;;  %s4081_s4 = inlined_call_operand.vmem [shape: f32[1,256], index: 4, kind: input, shape index: {}]   ;;  %s4082_s5 = inlined_call_operand.vmem [shape: bf16[256,256], index: 5, kind: input, shape index: {}]   ;;  %s4083_s6 = inlined_call_operand.vmem [shape: f32[1,256], index: 6, kind: input, shape index: {}]   ;;  %s4084_s7 = inlined_call_operand.hbm [shape: bf16[256,128], index: 7, kind: input, shape index: {}]   ;;  %s4085_s8 = inlined_call_operand.vmem [shape: f32[1,128], index: 8, kind: input, shape index: {}]   ;;  %s4086_s9 = inlined_call_operand.vmem [shape: f32[200,8], index: 9, kind: output, shape index: {}]  }
   0x1   :  { %4089 = sst [smem:[#allocation11_spill]] %s4080_s3 }
   0x2   :  { %14 = vsyncpa [#allocation3], 0 }
   0x3   :  { %15 = vsyncpa [#allocation5], 0  ;;  %s3407_s30 = smov 0   ;;  %s3409_s10 = smov 0  }
   0x4   :  { %s3411_s11 = smov 0  }
   0x5 LB: > { %s3420_s12 = sadd.s32 4294967295, %s3312_s11   ;;  %s3422_s13 = sadd.s32 1, %s3312_s11   ;;  %s3312_s11 = sphi %s3411_s11, %s4108_s11   ;;  %s3308_s10 = sphi %s3409_s10, %s4107_s10   ;;  %s3304_s30 = sphi %s3407_s30, %s4106_s30  }
   0x6   : > { %s219_s14 = ssub.s32 %s3312_s11, %s3422_s13  ;;  %s222_s15 = sadd.s32 1, %s3308_s10 }
   0x7   : > { %p220_p0 = scmp.eq.s32.totalorder %s219_s14, 0  ;;  %p232_p1 = scmp.ne.s32.totalorder %s3308_s10, %s3304_s30 }
   0x8   : > { %p233_p2 = scmp.eq.s32.totalorder %s3420_s12, 1  ;;  %p2581_p3 = scmp.ge.s32.totalorder %s3312_s11, 1 }
   0x9   : > { %s3430_s16 = scalar_select %p220_p0, %s3308_s10, %s222_s15  }
   0xa   : > { %p3432_p4 = por %p233_p2, %p232_p1  ;;  %p246_p5 = scmp.lt.s32.totalorder %s3312_s11, 3 }
   0xb   : > { %4090 = sst [smem:[#allocation10_spill]] %s3430_s16  ;;  %p4087_p6 = scmp.eq.s32.totalorder %s3420_s12, 0 }
   0xc   : > { %s4091_s17 = scalar_select %p3432_p4, 1, 0 }
   0xd   : > { %p3437_p7 = pnand %p2581_p3, %p246_p5  ;;  %s3346_s19 = smov [#allocation4]  }
   0xe   : > { %s274_s20 = sshll.u32 %s3346_s19, 4  ;;  %s3347_s22 = smov [#allocation2]   ;;  %s275_s20 = int_to_ptr.vmem [resolvable:$true] %s274_s20 }
   0xf   : > { %s4092_s18 = scalar_select %p3437_p7, 1, 0 }
  0x10   : > { %p2884_p8 = pneg %p3437_p7  ;;  %s258_s23 = sshll.u32 %s3347_s22, 4  ;;  %s3449_s23 = int_to_ptr.vmem [resolvable:$true] %s258_s23 }
  0x11   : > { %s4094_s3 = sld [smem:[#allocation11_spill]] }
  0x12   : > { %p3445_p9 = pnand %p4087_p6, %p2884_p8 }
  0x14   : > { %p3459_p11 = pneg %p3445_p9 }
  0x17   : > { %s3166_s26 = scalar_lea.hbm %s4094_s3, 8192 }
  0x18   : > { %p3167_p10 = scmp.ne.s32.totalorder %s4094_s3, %s3166_s26  ;;  %p3173_p0 = scmp.lt.u32.totalorder %s3166_s26, %s4094_s3 }
  0x1a   : > { %p3169_p12 = pnand %p3459_p11, %p3167_p10 }
  0x1c   : > { %p3170_p13 = pneg %p3169_p12 }
  0x1e   : > { %p3175_p1 = pnand %p3173_p0, %p3170_p13 }
  0x20   : > { %3178 = shalt.err (!%p3175_p1)
}
  0x21   : > { %s3179_s15 = scalar_lea.vmem %s275_s20, 8192  ;;  %p3187_p8 = scmp.lt.s32.totalorder %s275_s20, %s275_s20 }
  0x22   : > { %p3180_p2 = scmp.ne.s32.totalorder %s275_s20, %s3179_s15  ;;  %p3188_p6 = scmp.lt.s32.totalorder %s3179_s15, %s3179_s15 }
  0x24   : > { %p3182_p3 = pnand %p3180_p2, %p3459_p11  ;;  %p3189_p4 = por %p3188_p6, %p3187_p8 }
  0x26   : > { %p3183_p5 = pneg %p3182_p3 }
  0x28   : > { %p3190_p7 = pnand %p3189_p4, %p3183_p5 }
  0x2a   : > { %3193 = shalt.err (!%p3190_p7)
}
  0x2b   : > { %s3348_s19 = smov 128   ;;  %s3349_s22 = smov 8  }
  0x2c   : > { %2890 = dma.hbm_to_vmem [thread:$0]  (!%p3445_p9), %s4094_s3, 8192, %s275_s20, [#allocation5], %s3348_s19, %s3348_s19, %s3349_s22  }
  0x2d   : > { %s3194_s28 = scalar_lea.hbm %s4078_s1, 2048 }
  0x2e   : > { %p3195_p10 = scmp.ne.s32.totalorder %s4078_s1, %s3194_s28  ;;  %p3201_p7 = scmp.lt.u32.totalorder %s3194_s28, %s4078_s1 }
  0x30   : > { %p3197_p4 = pnand %p3195_p10, %p3459_p11 }
  0x32   : > { %p3198_p6 = pneg %p3197_p4 }
  0x34   : > { %p3203_p12 = pnand %p3201_p7, %p3198_p6 }
  0x36   : > { %3206 = shalt.err (!%p3203_p12)
}
  0x37   : > { %s3207_s20 = scalar_lea.vmem %s3449_s23, 2048  ;;  %p3215_p2 = scmp.lt.s32.totalorder %s3449_s23, %s3449_s23 }
  0x38   : > { %p3208_p13 = scmp.ne.s32.totalorder %s3449_s23, %s3207_s20  ;;  %p3216_p3 = scmp.lt.s32.totalorder %s3207_s20, %s3207_s20 }
  0x3a   : > { %p3210_p0 = pnand %p3208_p13, %p3459_p11  ;;  %p3217_p5 = por %p3216_p3, %p3215_p2 }
  0x3c   : > { %p3211_p1 = pneg %p3210_p0 }
  0x3e   : > { %p3218_p8 = pnand %p3217_p5, %p3211_p1 }
  0x40   : > { %3221 = shalt.err (!%p3218_p8)
}
  0x41   : > { %s3350_s19 = smov 512   ;;  %s3351_s16 = smov 32  }
  0x42   : > { %2887 = dma.hbm_to_vmem [thread:$0]  (!%p3445_p9), %s4078_s1, 2048, %s3449_s23, [#allocation3], %s3350_s19, %s3350_s19, %s3351_s16  }
  0x43   : > { %s3352_s25 = smov [#allocation6]   ;;  %s3222_s11 = scalar_lea.hbm %s4084_s7, 2048 }
  0x44   : > { %s296_s26 = sshll.u32 %s3352_s25, 4  ;;  %p3223_p10 = scmp.ne.s32.totalorder %s4084_s7, %s3222_s11  ;;  %s297_s26 = int_to_ptr.vmem [resolvable:$true] %s296_s26 }
  0x45   : > { %p3229_p7 = scmp.lt.u32.totalorder %s3222_s11, %s4084_s7 }
  0x46   : > { %p3225_p4 = pnand %p3223_p10, %p3459_p11 }
  0x48   : > { %p3226_p6 = pneg %p3225_p4 }
  0x4a   : > { %p3231_p12 = pnand %p3229_p7, %p3226_p6 }
  0x4c   : > { %3234 = shalt.err (!%p3231_p12)
}
  0x4d   : > { %s3235_s23 = scalar_lea.vmem %s297_s26, 2048  ;;  %p3243_p2 = scmp.lt.s32.totalorder %s297_s26, %s297_s26 }
  0x4e   : > { %p3236_p13 = scmp.ne.s32.totalorder %s297_s26, %s3235_s23  ;;  %p3244_p3 = scmp.lt.s32.totalorder %s3235_s23, %s3235_s23 }
  0x50   : > { %p3238_p0 = pnand %p3236_p13, %p3459_p11  ;;  %p3245_p5 = por %p3244_p3, %p3243_p2 }
  0x52   : > { %p3239_p1 = pneg %p3238_p0 }
  0x54   : > { %p3246_p8 = pnand %p3245_p5, %p3239_p1 }
  0x56   : > { %3249 = shalt.err (!%p3246_p8)
}
  0x57   : > { %s3353_s19 = smov 64   ;;  %s3354_s16 = smov 4  }
  0x58   : > { %2893 = dma.hbm_to_vmem [thread:$0]  (!%p3445_p9), %s4084_s7, 2048, %s297_s26, [#allocation5], %s3353_s19, %s3353_s19, %s3354_s16  }
  0x59   : > { %p4096_p10 = scmp.ne.s32.totalorder %s4092_s18, 0 }
  0x5a   : > { %p4097_p4 = scmp.eq.s32.totalorder (!%p4096_p10), %s3420_s12, 0 }
  0x5b   : > { %332 = sbr.rel (%p4096_p10) target bundleno = 1449 (0x5a9), region = 56 }
  0x62   : > { %3295 = dma.done.wait (%p4097_p4), [#allocation3], 2048   ;;  %p4098_p11 = pmov %p4097_p4 }
  0x63   : > { %p4099_p6 = pmov %p4097_p4 }
  0x64   : > { %3297 = vsyncadd (%p4098_p11), [#allocation3], 4294965248 }
  0x65   : > { %3299 = dma.done.wait (%p4099_p6), [#allocation5], 10240   ;;  %p4100_p7 = pmov %p4097_p4 }
  0x66   : > { %s3527_s21 = smul.u32 13, %s3420_s12  ;;  %v3355_v0 = vmov 0.0   ;;  %v413_v1 = vld [vmem:[#allocation2 + $0x8] sm:$0xff]  ;;  %v412_v3 = vld [vmem:[#allocation2] sm:$0xff]  ;;  %v415_v14 = vld [vmem:[#allocation2 + $0x18] sm:$0xff]  ;;  %vm450_vm0 = vcmask 261120  }
  0x67   : > { %3301 = vsyncadd (%p4100_p7), [#allocation5], 4294957056  ;;  %554 = vmatprep.mubr.f32.mxu0 %v3355_v0  ;;  %697 = vmatprep.mubr.f32.mxu1 %v3355_v0  ;;  %v417_v2 = vld [vmem:[#allocation2 + $0x28] sm:$0xff]  ;;  %v416_v5 = vld [vmem:[#allocation2 + $0x20] sm:$0xff]  ;;  %s376_s16 = sand.u32 1, %s3304_s30   ;;  %vm2270_vm1 = vcmask 64512  }
  0x68   : > { %p384_p9 = scmp.lt.s32.totalorder %s3527_s21, 24  ;;  %v2801_v4 = vpack.c.bf16 %v417_v2, %v413_v1  ;;  %v421_v6 = vld [vmem:[#allocation2 + $0x48] sm:$0xff]  ;;  %v2803_v8 = vpack.c.bf16 %v416_v5, %v412_v3  ;;  %v420_v10 = vld [vmem:[#allocation2 + $0x40] sm:$0xff]  ;;  %v419_v15 = vld [vmem:[#allocation2 + $0x38] sm:$0xff]  ;;  %s2871_s22 = smul.u32 104, %s376_s16 }
  0x69   : > { %v425_v7 = vld [vmem:[#allocation2 + $0x68] sm:$0xff]  ;;  %v424_v11 = vld [vmem:[#allocation2 + $0x60] sm:$0xff]  ;;  %v414_v16 = vld [vmem:[#allocation2 + $0x10] sm:$0xff]  ;;  %v2809_v18 = vpack.c.bf16 %v419_v15, %v415_v14  ;;  %p4101_p12 = scmp.ne.s32.totalorder %s4091_s17, 0 }
  0x6a   : > { %s385_s18 = scalar_select %p384_p9, %s3527_s21, 24  ;;  %v2805_v9 = vpack.c.bf16 %v425_v7, %v421_v6  ;;  %2802 = vmatprep.subr.bf16.mxu0 %v2801_v4  ;;  %v2807_v12 = vpack.c.bf16 %v424_v11, %v420_v10  ;;  %v418_v17 = vld [vmem:[#allocation2 + $0x30] sm:$0xff]  ;;  %v423_v20 = vld [vmem:[#allocation2 + $0x58] sm:$0xff]  ;;  %v3002_v25 = vld [vmem:[#allocation4] ss:$8 sps:$4 sm:$0xff]  }
  0x6b   : > { %2804 = vmatpush1.bf16.msra.mxu0 %v2803_v8  ;;  %v2811_v19 = vpack.c.bf16 %v418_v17, %v414_v16  ;;  %v427_v21 = vld [vmem:[#allocation2 + $0x78] sm:$0xff]  ;;  %v422_v22 = vld [vmem:[#allocation2 + $0x50] sm:$0xff]  ;;  %2810 = vmatprep.subr.bf16.mxu1 %v2809_v18  ;;  %v3004_v26 = vld [vmem:[#allocation4 + $0x4] ss:$8 sps:$4 sm:$0xff]   ;;  %v430_v8 = vlaneseq  ;;  %s3949_s3 = scalar_lea.vmem [#allocation7], %s2871_s22   ;;  %s2292_s30 = ssub.s32 (%p4101_p12), 25, %s3527_s21 }
  0x6c   : > { %s2590_s29 = sshll.u32 %s385_s18, 3  ;;  %2806 = vmatprep.subr.bf16.mxu0 %v2805_v9  ;;  %v2813_v23 = vpack.c.bf16 %v427_v21, %v423_v20  ;;  %v426_v24 = vld [vmem:[#allocation2 + $0x70] sm:$0xff]  ;;  %v3010_v32 = vld [vmem:[#allocation4 + $0x24] ss:$8 sps:$4 sm:$0xff]   ;;  %v3008_v33 = vld [vmem:[#allocation4 + $0x20] ss:$8 sps:$4 sm:$0xff]  }
  0x6d   : > { %s3536_s26 = scalar_lea.vmem %s4077_s0, %s2590_s29  ;;  %2812 = vmatpush1.bf16.msra.mxu1 %v2811_v19  ;;  %v2815_v28 = vpack.c.bf16 %v426_v24, %v422_v22  ;;  %v3007_v29 = vld [vmem:[#allocation4 + $0x14] ss:$8 sps:$4 sm:$0xff]   ;;  %v3005_v30 = vld [vmem:[#allocation4 + $0x10] ss:$8 sps:$4 sm:$0xff]   ;;  %v3016_v38 = vld [vmem:[#allocation4 + $0x44] ss:$8 sps:$4 sm:$0xff]  }
  0x6e   : > { %v399_v13 = vld [vmem:[%s3536_s26] sm:$0xff]  ;;  %v400_v27 = vld [vmem:[%s3536_s26 + $0x8] sm:$0xff]  ;;  %2814 = vmatprep.subr.bf16.mxu1 %v2813_v23  ;;  %v401_v31 = vld [vmem:[%s3536_s26 + $0x10] sm:$0xff]  ;;  %v431_v9 = vshrl.u32 %v430_v8, 7  ;;  %s2742_s18 = smul.u32 (%p4101_p12), 104, %s3420_s12  ;;  %p2293_p13 = scmp.lt.s32.totalorder (%p4101_p12), %s2292_s30, 13 }
  0x6f   : > { %2808 = vmatpush1.bf16.msra.mxu0 %v2807_v12  ;;  %v402_v34 = vld [vmem:[%s3536_s26 + $0x18] sm:$0xff]  ;;  %v403_v37 = vld [vmem:[%s3536_s26 + $0x20] sm:$0xff]  ;;  %v404_v39 = vld [vmem:[%s3536_s26 + $0x28] sm:$0xff] }
  0x70   : > { %1252 = vmatprep.subr.bf16.mxu0 %v3004_v26  ;;  %v3013_v35 = vld [vmem:[#allocation4 + $0x34] ss:$8 sps:$4 sm:$0xff]   ;;  %v3011_v36 = vld [vmem:[#allocation4 + $0x30] ss:$8 sps:$4 sm:$0xff]   ;;  %v3014_v40 = vld [vmem:[#allocation4 + $0x40] ss:$8 sps:$4 sm:$0xff]   ;;  %s3995_s25 = scalar_lea.vmem (%p4101_p12), %s4086_s9, %s2742_s18  }
  0x71   : > { %2816 = vmatpush1.bf16.msra.mxu1 %v2815_v28  ;;  %v3019_v41 = vld [vmem:[#allocation4 + $0x54] ss:$8 sps:$4 sm:$0xff]   ;;  %v3017_v42 = vld [vmem:[#allocation4 + $0x50] ss:$8 sps:$4 sm:$0xff]   ;;  %v3022_v44 = vld [vmem:[#allocation4 + $0x64] ss:$8 sps:$4 sm:$0xff]  }
  0x72   : > { %2591 = vmatmul.mubr.msk.f32.vlgmr.msra.gmra.mrb[0].mxu0 %vm450_vm0, %v399_v13  ;;  %v405_v43 = vld [vmem:[%s3536_s26 + $0x30] sm:$0xff]  ;;  %v3020_v45 = vld [vmem:[#allocation4 + $0x60] ss:$8 sps:$4 sm:$0xff]   ;;  %v406_v46 = vld [vmem:[%s3536_s26 + $0x38] sm:$0xff]  ;;  %v3601_v10 = vsub.s32 0, %v431_v9  ;;  %v3606_v11 = vsub.s32 1, %v431_v9 }
  0x73   : > { %560 = vmatprep.mubr.f32.mxu0 %v3355_v0  ;;  %1253 = vmatpush1.bf16.msra.mxu0 %v3002_v25  ;;  %v3025_v47 = vld [vmem:[#allocation4 + $0x74] ss:$8 sps:$4 sm:$0xff]   ;;  %v3023_v48 = vld [vmem:[#allocation4 + $0x70] ss:$8 sps:$4 sm:$0xff]   ;;  %v407_v49 = vld [vmem:[%s3536_s26 + $0x40] sm:$0xff]  ;;  %v440_v18 = vsub.s32 2, %v431_v9 }
  0x74   : > { %1254 = vmatprep.subr.bf16.mxu0 %v3007_v29  ;;  %2604 = vmatmul.mubr.msk.f32.vlgmr.msra.gmra.mrb[0].mxu1 %vm450_vm0, %v399_v13  ;;  %v3028_v50 = vld [vmem:[#allocation4 + $0x84] ss:$8 sps:$4 sm:$0xff]   ;;  %v3026_v51 = vld [vmem:[#allocation4 + $0x80] ss:$8 sps:$4 sm:$0xff]   ;;  %v3031_v53 = vld [vmem:[#allocation4 + $0x94] ss:$8 sps:$4 sm:$0xff]  }
  0x75   : > { %703 = vmatprep.mubr.f32.mxu1 %v3355_v0  ;;  %v408_v52 = vld [vmem:[%s3536_s26 + $0x48] sm:$0xff]  ;;  %v3029_v54 = vld [vmem:[#allocation4 + $0x90] ss:$8 sps:$4 sm:$0xff]   ;;  %v3037_v59 = vld [vmem:[#allocation4 + $0xb4] ss:$8 sps:$4 sm:$0xff]   ;;  %v444_v21 = vsub.s32 3, %v431_v9 }
  0x76   : > { %2592 = vmatmul.mubr.msk.f32.gmra.mrb[2].mxu0 %vm450_vm0, %v400_v27  ;;  %v409_v55 = vld [vmem:[%s3536_s26 + $0x50] sm:$0xff]  ;;  %v3034_v56 = vld [vmem:[#allocation4 + $0xa4] ss:$8 sps:$4 sm:$0xff]   ;;  %v3032_v57 = vld [vmem:[#allocation4 + $0xa0] ss:$8 sps:$4 sm:$0xff]  }
  0x77   : > { %566 = vmatprep.mubr.f32.mxu0 %v3355_v0  ;;  %1255 = vmatpush1.bf16.msra.mxu0 %v3005_v30  ;;  %v410_v58 = vld [vmem:[%s3536_s26 + $0x58] sm:$0xff]  ;;  %v411_v61 = vld [vmem:[%s3536_s26 + $0x60] sm:$0xff] }
  0x78   : > { %1256 = vmatprep.subr.bf16.mxu0 %v3010_v32  ;;  %2605 = vmatmul.mubr.msk.f32.gmra.mrb[2].mxu1 %vm450_vm0, %v400_v27  ;;  %v3035_v60 = vld [vmem:[#allocation4 + $0xb0] ss:$8 sps:$4 sm:$0xff]   ;;  %v3040_v62 = vld [vmem:[#allocation4 + $0xc4] ss:$8 sps:$4 sm:$0xff]   ;;  %v3038_v63 = vld [vmem:[#allocation4 + $0xc0] ss:$8 sps:$4 sm:$0xff]  }
  0x79   : > { %709 = vmatprep.mubr.f32.mxu1 %v3355_v0  ;;  %v3043_v1 = vld [vmem:[#allocation4 + $0xd4] ss:$8 sps:$4 sm:$0xff]   ;;  %v3041_v2 = vld [vmem:[#allocation4 + $0xd0] ss:$8 sps:$4 sm:$0xff]   ;;  %v3046_v3 = vld [vmem:[#allocation4 + $0xe4] ss:$8 sps:$4 sm:$0xff]  }
  0x7a   : > { %2593 = vmatmul.mubr.msk.f32.gmra.mrb[4].mxu0 %vm450_vm0, %v401_v31  ;;  %v3044_v4 = vld [vmem:[#allocation4 + $0xe0] ss:$8 sps:$4 sm:$0xff]   ;;  %v3049_v5 = vld [vmem:[#allocation4 + $0xf4] ss:$8 sps:$4 sm:$0xff]   ;;  %v3047_v6 = vld [vmem:[#allocation4 + $0xf0] ss:$8 sps:$4 sm:$0xff]  }
  0x7b   : > { %572 = vmatprep.mubr.f32.mxu0 %v3355_v0  ;;  %1257 = vmatpush1.bf16.msra.mxu0 %v3008_v33  ;;  %v3052_v7 = vld [vmem:[#allocation4 + $0x104] ss:$8 sps:$4 sm:$0xff]   ;;  %v3098_v12 = vld [vmem:[%s4082_s5] ss:$8 sps:$4 sm:$0xff]   ;;  %v3103_v14 = vld [vmem:[%s4082_s5 + $0x14] ss:$8 sps:$4 sm:$0xff]  }
  0x7c   : > { %1258 = vmatprep.subr.bf16.mxu0 %v3013_v35  ;;  %2606 = vmatmul.mubr.msk.f32.gmra.mrb[4].mxu1 %vm450_vm0, %v401_v31  ;;  %v3100_v13 = vld [vmem:[%s4082_s5 + $0x4] ss:$8 sps:$4 sm:$0xff]   ;;  %v3101_v19 = vld [vmem:[%s4082_s5 + $0x10] ss:$8 sps:$4 sm:$0xff]   ;;  %v3104_v27 = vld [vmem:[%s4082_s5 + $0x20] ss:$8 sps:$4 sm:$0xff]  }
  0x7d   : > { %715 = vmatprep.mubr.f32.mxu1 %v3355_v0  ;;  %1698 = vmatprep.subr.bf16.mxu1 %v3100_v13  ;;  %v3106_v22 = vld [vmem:[%s4082_s5 + $0x24] ss:$8 sps:$4 sm:$0xff]   ;;  %v3109_v31 = vld [vmem:[%s4082_s5 + $0x34] ss:$8 sps:$4 sm:$0xff]  }
  0x7e   : > { %2594 = vmatmul.mubr.msk.f32.gmra.mrb[6].mxu0 %vm450_vm0, %v402_v34  ;;  %1699 = vmatpush1.bf16.msra.mxu1 %v3098_v12 }
  0x7f   : > { %578 = vmatprep.mubr.f32.mxu0 %v3355_v0  ;;  %1259 = vmatpush1.bf16.msra.mxu0 %v3011_v36 }
  0x80   : > { %1260 = vmatprep.subr.bf16.mxu0 %v3016_v38  ;;  %2607 = vmatmul.mubr.msk.f32.gmra.mrb[6].mxu1 %vm450_vm0, %v402_v34 }
  0x81   : > { %721 = vmatprep.mubr.f32.mxu1 %v3355_v0  ;;  %1700 = vmatprep.subr.bf16.mxu1 %v3103_v14  ;;  %v3113_v14 = vld [vmem:[%s4082_s5 + $0x50] ss:$8 sps:$4 sm:$0xff]  }
  0x82   : > { %2595 = vmatmul.mubr.msk.f32.gmra.mrb[8].mxu0 %vm450_vm0, %v403_v37  ;;  %1701 = vmatpush1.bf16.msra.mxu1 %v3101_v19 }
  0x83   : > { %584 = vmatprep.mubr.f32.mxu0 %v3355_v0  ;;  %1261 = vmatpush1.bf16.msra.mxu0 %v3014_v40 }
  0x84   : > { %1262 = vmatprep.subr.bf16.mxu0 %v3019_v41  ;;  %2608 = vmatmul.mubr.msk.f32.gmra.mrb[8].mxu1 %vm450_vm0, %v403_v37  ;;  %v3107_v41 = vld [vmem:[%s4082_s5 + $0x30] ss:$8 sps:$4 sm:$0xff]  }
  0x85   : > { %727 = vmatprep.mubr.f32.mxu1 %v3355_v0  ;;  %1702 = vmatprep.subr.bf16.mxu1 %v3106_v22  ;;  %v3118_v22 = vld [vmem:[%s4082_s5 + $0x64] ss:$8 sps:$4 sm:$0xff]  }
  0x86   : > { %2596 = vmatmul.mubr.msk.f32.gmra.mrb[10].mxu0 %vm450_vm0, %v404_v39  ;;  %1703 = vmatpush1.bf16.msra.mxu1 %v3104_v27  ;;  %v3061_v27 = vld [vmem:[#allocation4 + $0x134] ss:$8 sps:$4 sm:$0xff]  }
  0x87   : > { %590 = vmatprep.mubr.f32.mxu0 %v3355_v0  ;;  %1263 = vmatpush1.bf16.msra.mxu0 %v3017_v42 }
  0x88   : > { %1264 = vmatprep.subr.bf16.mxu0 %v3022_v44  ;;  %2609 = vmatmul.mubr.msk.f32.gmra.mrb[10].mxu1 %vm450_vm0, %v404_v39 }
  0x89   : > { %733 = vmatprep.mubr.f32.mxu1 %v3355_v0  ;;  %1704 = vmatprep.subr.bf16.mxu1 %v3109_v31 }
  0x8a   : > { %2597 = vmatmul.mubr.msk.f32.gmra.mrb[12].mxu0 %vm450_vm0, %v405_v43  ;;  %1705 = vmatpush1.bf16.msra.mxu1 %v3107_v41 }
  0x8b   : > { %596 = vmatprep.mubr.f32.mxu0 %v3355_v0  ;;  %1265 = vmatpush1.bf16.msra.mxu0 %v3020_v45 }
  0x8c   : > { %1266 = vmatprep.subr.bf16.mxu0 %v3025_v47  ;;  %2610 = vmatmul.mubr.msk.f32.gmra.mrb[12].mxu1 %vm450_vm0, %v405_v43 }
  0x8d   : > { %739 = vmatprep.mubr.f32.mxu1 %v3355_v0 }
  0x8e   : > { %2598 = vmatmul.mubr.msk.f32.gmra.mrb[14].mxu0 %vm450_vm0, %v406_v46 }
  0x8f   : > { %602 = vmatprep.mubr.f32.mxu0 %v3355_v0  ;;  %1267 = vmatpush1.bf16.msra.mxu0 %v3023_v48 }
  0x90   : > { %1268 = vmatprep.subr.bf16.mxu0 %v3028_v50  ;;  %2611 = vmatmul.mubr.msk.f32.gmra.mrb[14].mxu1 %vm450_vm0, %v406_v46  ;;  %v3112_v46 = vld [vmem:[%s4082_s5 + $0x44] ss:$8 sps:$4 sm:$0xff]   ;;  %v3055_v50 = vld [vmem:[#allocation4 + $0x114] ss:$8 sps:$4 sm:$0xff]  }
  0x91   : > { %745 = vmatprep.mubr.f32.mxu1 %v3355_v0  ;;  %1706 = vmatprep.subr.bf16.mxu1 %v3112_v46  ;;  %v3064_v46 = vld [vmem:[#allocation4 + $0x144] ss:$8 sps:$4 sm:$0xff]  }
  0x92   : > { %2599 = vmatmul.mubr.msk.f32.gmra.mrb[16].mxu0 %vm450_vm0, %v407_v49 }
  0x93   : > { %608 = vmatprep.mubr.f32.mxu0 %v3355_v0  ;;  %1269 = vmatpush1.bf16.msra.mxu0 %v3026_v51 }
  0x94   : > { %1270 = vmatprep.subr.bf16.mxu0 %v3031_v53  ;;  %2612 = vmatmul.mubr.msk.f32.gmra.mrb[16].mxu1 %vm450_vm0, %v407_v49  ;;  %v3050_v49 = vld [vmem:[#allocation4 + $0x100] ss:$8 sps:$4 sm:$0xff]  }
  0x95   : > { %751 = vmatprep.mubr.f32.mxu1 %v3355_v0 }
  0x96   : > { %2600 = vmatmul.mubr.msk.f32.gmra.mrb[18].mxu0 %vm450_vm0, %v408_v52 }
  0x97   : > { %614 = vmatprep.mubr.f32.mxu0 %v3355_v0  ;;  %1271 = vmatpush1.bf16.msra.mxu0 %v3029_v54 }
  0x98   : > { %1272 = vmatprep.subr.bf16.mxu0 %v3034_v56  ;;  %2613 = vmatmul.mubr.msk.f32.gmra.mrb[18].mxu1 %vm450_vm0, %v408_v52  ;;  %v3110_v56 = vld [vmem:[%s4082_s5 + $0x40] ss:$8 sps:$4 sm:$0xff]  }
  0x99   : > { %757 = vmatprep.mubr.f32.mxu1 %v3355_v0  ;;  %1707 = vmatpush1.bf16.msra.mxu1 %v3110_v56 }
  0x9a   : > { %2601 = vmatmul.mubr.msk.f32.gmra.mrb[20].mxu0 %vm450_vm0, %v409_v55 }
  0x9b   : > { %620 = vmatprep.mubr.f32.mxu0 %v3355_v0  ;;  %1273 = vmatpush1.bf16.msra.mxu0 %v3032_v57 }
  0x9c   : > { %1274 = vmatprep.subr.bf16.mxu0 %v3037_v59  ;;  %2614 = vmatmul.mubr.msk.f32.gmra.mrb[20].mxu1 %vm450_vm0, %v409_v55 }
  0x9d   : > { %763 = vmatprep.mubr.f32.mxu1 %v3355_v0 }
  0x9e   : > { %2602 = vmatmul.mubr.msk.f32.gmra.mrb[22].mxu0 %vm450_vm0, %v410_v58 }
  0x9f   : > { %626 = vmatprep.mubr.f32.mxu0 %v3355_v0  ;;  %1275 = vmatpush1.bf16.msra.mxu0 %v3035_v60 }
  0xa0   : > { %1276 = vmatprep.subr.bf16.mxu0 %v3040_v62  ;;  %2615 = vmatmul.mubr.msk.f32.gmra.mrb[22].mxu1 %vm450_vm0, %v410_v58  ;;  %v3115_v62 = vld [vmem:[%s4082_s5 + $0x54] ss:$8 sps:$4 sm:$0xff]  }
  0xa1   : > { %769 = vmatprep.mubr.f32.mxu1 %v3355_v0  ;;  %v428_v0 = vld [vmem:[%s4079_s2] sm:$0xf]  ;;  %1708 = vmatprep.subr.bf16.mxu1 %v3115_v62 }
  0xa2   : > { %2603 = vmatmul.mubr.msk.f32.gmra.mrb[24].mxu0 %vm450_vm0, %v411_v61  ;;  %v3618_v15 = vrot.slane %v428_v0, %v3601_v10  ;;  %v3621_v17 = vrot.slane %v428_v0, %v3606_v11  ;;  %v3631_v26 = vrot.slane %v428_v0, %v440_v18  ;;  %v3637_v30 = vrot.slane %v428_v0, %v444_v21 }
  0xa3   : > { %1277 = vmatpush1.bf16.msra.mxu0 %v3038_v63  ;;  %1709 = vmatpush1.bf16.msra.mxu1 %v3113_v14 }
  0xa4   : > { %2616 = vmatmul.mubr.msk.f32.gmra.mrb[24].mxu1 %vm450_vm0, %v411_v61  ;;  %1278 = vmatprep.subr.bf16.mxu0 %v3043_v1 }
  0xa5   : > { %1710 = vmatprep.subr.bf16.mxu1 %v3118_v22 }
  0xa7   : > { %1279 = vmatpush1.bf16.msra.mxu0 %v3041_v2  ;;  %v3053_v2 = vld [vmem:[#allocation4 + $0x110] ss:$8 sps:$4 sm:$0xff]  }
  0xa8   : > { %1280 = vmatprep.subr.bf16.mxu0 %v3046_v3 }
  0xab   : > { %1281 = vmatpush1.bf16.msra.mxu0 %v3044_v4 }
  0xac   : > { %1282 = vmatprep.subr.bf16.mxu0 %v3049_v5  ;;  %v3058_v5 = vld [vmem:[#allocation4 + $0x124] ss:$8 sps:$4 sm:$0xff]  }
  0xaf   : > { %1283 = vmatpush1.bf16.msra.mxu0 %v3047_v6 }
  0xb0   : > { %1353 = vmatprep.subr.bf16.mxu0 %v3052_v7 }
 0x145   : > { %v556_v16 = vpop.f32.mrb[0].mxu0 }
 0x146   : > { %v558_v20 = vpop.f32.mrb[1].mxu0  ;;  %v557_v23 = vadd.f32 %v556_v16, %v3618_v15 }
 0x147   : > { %v559_v24 = vadd.f32 %v558_v20, %v3621_v17  ;;  %v699_v35 = vpop.f32.mrb[0].mxu1 }
 0x148   : > { %v776_v33 = vmax.f32 %v557_v23, 0.0  ;;  %v700_v39 = vadd.f32 %v699_v35, %v3631_v26  ;;  %v701_v40 = vpop.f32.mrb[1].mxu1 }
 0x149   : > { %v562_v25 = vpop.f32.mrb[2].mxu0  ;;  %v777_v36 = vmax.f32 %v559_v24, 0.0  ;;  %v702_v45 = vadd.f32 %v701_v40, %v3637_v30  ;;  %v3121_v40 = vld [vmem:[%s4082_s5 + $0x74] ss:$8 sps:$4 sm:$0xff]  }
 0x14a   : > { %v563_v28 = vadd.f32 %v562_v25, %v3618_v15  ;;  %v564_v29 = vpop.f32.mrb[3].mxu0  ;;  %v778_v53 = vmax.f32 %v700_v39, 0.0  ;;  %v3056_v25 = vld [vmem:[#allocation4 + $0x120] ss:$8 sps:$4 sm:$0xff]  }
 0x14b   : > { %v565_v32 = vadd.f32 %v564_v29, %v3621_v17  ;;  %v705_v51 = vpop.f32.mrb[2].mxu1  ;;  %v779_v60 = vmax.f32 %v702_v45, 0.0 }
 0x14c   : > { %v780_v34 = vmax.f32 %v563_v28, 0.0  ;;  %v706_v54 = vadd.f32 %v705_v51, %v3631_v26  ;;  %v707_v55 = vpop.f32.mrb[3].mxu1 }
 0x14d   : > { %v781_v37 = vmax.f32 %v565_v32, 0.0  ;;  %v568_v38 = vpop.f32.mrb[4].mxu0  ;;  %v708_v61 = vadd.f32 %v707_v55, %v3637_v30 }
 0x14e   : > { %v828_v42 = vpack.c.bf16 %v780_v34, %v776_v33  ;;  %v569_v43 = vadd.f32 %v568_v38, %v3618_v15  ;;  %v570_v44 = vpop.f32.mrb[5].mxu0  ;;  %v782_v3 = vmax.f32 %v706_v54, 0.0  ;;  %v3116_v34 = vld [vmem:[%s4082_s5 + $0x60] ss:$8 sps:$4 sm:$0xff]   ;;  %v3119_v54 = vld [vmem:[%s4082_s5 + $0x70] ss:$8 sps:$4 sm:$0xff]  }
 0x14f   : > { %v829_v47 = vpack.c.bf16 %v781_v37, %v777_v36  ;;  %v571_v48 = vadd.f32 %v570_v44, %v3621_v17  ;;  %v783_v6 = vmax.f32 %v708_v61, 0.0  ;;  %v711_v7 = vpop.f32.mrb[4].mxu1  ;;  %1711 = vmatpush1.bf16.msra.mxu1 %v3116_v34  ;;  %v3125_v34 = vld [vmem:[%s4082_s5 + $0x90] ss:$8 sps:$4 sm:$0xff]  }
 0x150   : > { %v784_v57 = vmax.f32 %v569_v43, 0.0  ;;  %v3663_v0 = vpack.c.bf16 %v782_v3, %v778_v53  ;;  %v712_v12 = vadd.f32 %v711_v7, %v3631_v26  ;;  %v713_v13 = vpop.f32.mrb[5].mxu1  ;;  %v3059_v43 = vld [vmem:[#allocation4 + $0x130] ss:$8 sps:$4 sm:$0xff]   ;;  %1712 = vmatprep.subr.bf16.mxu1 %v3121_v40  ;;  %v3122_v7 = vld [vmem:[%s4082_s5 + $0x80] ss:$8 sps:$4 sm:$0xff]  }
 0x151   : > { %1284 = vmatprep.mubr.bf16.mxu0 %v829_v47  ;;  %v574_v52 = vpop.f32.mrb[6].mxu0  ;;  %v785_v63 = vmax.f32 %v571_v48, 0.0  ;;  %v3670_v20 = vpack.c.bf16 %v783_v6, %v779_v60  ;;  %v714_v21 = vadd.f32 %v713_v13, %v3637_v30  ;;  %v3124_v60 = vld [vmem:[%s4082_s5 + $0x84] ss:$8 sps:$4 sm:$0xff]  }
 0x152   : > { %v575_v58 = vadd.f32 %v574_v52, %v3618_v15  ;;  %1285 = vmatmul.mubr.bf16.vlgmr.msra.gmra.mrb[28].mxu0 %v828_v42  ;;  %v576_v59 = vpop.f32.mrb[7].mxu0  ;;  %v786_v31 = vmax.f32 %v712_v12, 0.0  ;;  %v3130_v40 = vld [vmem:[%s4082_s5 + $0xa4] ss:$8 sps:$4 sm:$0xff]  }
 0x153   : > { %1354 = vmatpush1.bf16.msra.mxu0 %v3050_v49  ;;  %v577_v1 = vadd.f32 %v576_v59, %v3621_v17  ;;  %v717_v28 = vpop.f32.mrb[6].mxu1  ;;  %v787_v38 = vmax.f32 %v714_v21, 0.0  ;;  %1713 = vmatpush1.bf16.msra.mxu1 %v3119_v54  ;;  %v3065_v21 = vld [vmem:[#allocation4 + $0x150] ss:$8 sps:$4 sm:$0xff]  }
 0x154   : > { %v788_v4 = vmax.f32 %v575_v58, 0.0  ;;  %1355 = vmatprep.subr.bf16.mxu0 %v3055_v50  ;;  %v718_v32 = vadd.f32 %v717_v28, %v3631_v26  ;;  %v719_v33 = vpop.f32.mrb[7].mxu1  ;;  %1714 = vmatprep.subr.bf16.mxu1 %v3124_v60 }
 0x155   : > { %v789_v8 = vmax.f32 %v577_v1, 0.0  ;;  %v580_v9 = vpop.f32.mrb[8].mxu0  ;;  %v720_v39 = vadd.f32 %v719_v33, %v3637_v30  ;;  %v3067_v1 = vld [vmem:[#allocation4 + $0x154] ss:$8 sps:$4 sm:$0xff]  }
 0x156   : > { %v832_v16 = vpack.c.bf16 %v788_v4, %v784_v57  ;;  %v581_v18 = vadd.f32 %v580_v9, %v3618_v15  ;;  %v582_v19 = vpop.f32.mrb[9].mxu0  ;;  %v790_v44 = vmax.f32 %v718_v32, 0.0 }
 0x157   : > { %v833_v23 = vpack.c.bf16 %v789_v8, %v785_v63  ;;  %1356 = vmatpush1.bf16.msra.mxu0 %v3053_v2  ;;  %v583_v24 = vadd.f32 %v582_v19, %v3621_v17  ;;  %v791_v47 = vmax.f32 %v720_v39, 0.0  ;;  %v723_v48 = vpop.f32.mrb[8].mxu1  ;;  %v3062_v63 = vld [vmem:[#allocation4 + $0x140] ss:$8 sps:$4 sm:$0xff]   ;;  %1715 = vmatpush1.bf16.msra.mxu1 %v3122_v7 }
 0x158   : > { %1357 = vmatprep.subr.bf16.mxu0 %v3058_v5  ;;  %v792_v35 = vmax.f32 %v581_v18, 0.0  ;;  %v3687_v51 = vpack.c.bf16 %v790_v44, %v786_v31  ;;  %v724_v52 = vadd.f32 %v723_v48, %v3631_v26  ;;  %v725_v53 = vpop.f32.mrb[9].mxu1  ;;  %v3073_v44 = vld [vmem:[#allocation4 + $0x174] ss:$8 sps:$4 sm:$0xff]  }
 0x159   : > { %v586_v29 = vpop.f32.mrb[10].mxu0  ;;  %1294 = vmatprep.mubr.bf16.mxu0 %v833_v23  ;;  %v793_v41 = vmax.f32 %v583_v24, 0.0  ;;  %v3694_v58 = vpack.c.bf16 %v791_v47, %v787_v38  ;;  %v726_v59 = vadd.f32 %v725_v53, %v3637_v30  ;;  %v3070_v24 = vld [vmem:[#allocation4 + $0x164] ss:$8 sps:$4 sm:$0xff]  }
 0x15a   : > { %v587_v36 = vadd.f32 %v586_v29, %v3618_v15  ;;  %v588_v37 = vpop.f32.mrb[11].mxu0  ;;  %1295 = vmatmul.mubr.bf16.gmra.mrb[32].mxu0 %v832_v16  ;;  %v794_v4 = vmax.f32 %v724_v52, 0.0  ;;  %v3127_v16 = vld [vmem:[%s4082_s5 + $0x94] ss:$8 sps:$4 sm:$0xff]  }
 0x15b   : > { %1358 = vmatpush1.bf16.msra.mxu0 %v3056_v25  ;;  %v589_v42 = vadd.f32 %v588_v37, %v3621_v17  ;;  %v729_v2 = vpop.f32.mrb[10].mxu1  ;;  %v795_v13 = vmax.f32 %v726_v59, 0.0  ;;  %1716 = vmatprep.subr.bf16.mxu1 %v3127_v16 }
 0x15c   : > { %v796_v45 = vmax.f32 %v587_v36, 0.0  ;;  %1359 = vmatprep.subr.bf16.mxu0 %v3061_v27  ;;  %v730_v5 = vadd.f32 %v729_v2, %v3631_v26  ;;  %v731_v6 = vpop.f32.mrb[11].mxu1  ;;  %1717 = vmatpush1.bf16.msra.mxu1 %v3125_v34 }
 0x15d   : > { %v797_v49 = vmax.f32 %v589_v42, 0.0  ;;  %v592_v50 = vpop.f32.mrb[12].mxu0  ;;  %v732_v14 = vadd.f32 %v731_v6, %v3637_v30  ;;  %1718 = vmatprep.subr.bf16.mxu1 %v3130_v40  ;;  %v3139_v40 = vld [vmem:[%s4082_s5 + $0xd4] ss:$8 sps:$4 sm:$0xff]  }
 0x15e   : > { %v836_v55 = vpack.c.bf16 %v796_v45, %v792_v35  ;;  %v593_v56 = vadd.f32 %v592_v50, %v3618_v15  ;;  %v594_v57 = vpop.f32.mrb[13].mxu0  ;;  %v798_v22 = vmax.f32 %v730_v5, 0.0  ;;  %v3128_v50 = vld [vmem:[%s4082_s5 + $0xa0] ss:$8 sps:$4 sm:$0xff]  }
 0x15f   : > { %v837_v61 = vpack.c.bf16 %v797_v49, %v793_v41  ;;  %1360 = vmatpush1.bf16.msra.mxu0 %v3059_v43  ;;  %v595_v62 = vadd.f32 %v594_v57, %v3621_v17  ;;  %v799_v25 = vmax.f32 %v732_v14, 0.0  ;;  %v735_v27 = vpop.f32.mrb[12].mxu1  ;;  %v3068_v43 = vld [vmem:[#allocation4 + $0x160] ss:$8 sps:$4 sm:$0xff]   ;;  %v3133_v57 = vld [vmem:[%s4082_s5 + $0xb4] ss:$8 sps:$4 sm:$0xff]  }
 0x160   : > { %1361 = vmatprep.subr.bf16.mxu0 %v3064_v46  ;;  %v800_v8 = vmax.f32 %v593_v56, 0.0  ;;  %v3711_v31 = vpack.c.bf16 %v798_v22, %v794_v4  ;;  %v736_v32 = vadd.f32 %v735_v27, %v3631_v26  ;;  %v737_v33 = vpop.f32.mrb[13].mxu1  ;;  %1719 = vmatpush1.bf16.msra.mxu1 %v3128_v50 }
 0x161   : > { %v598_v3 = vpop.f32.mrb[14].mxu0  ;;  %1304 = vmatprep.mubr.bf16.mxu0 %v837_v61  ;;  %v801_v18 = vmax.f32 %v595_v62, 0.0  ;;  %v3718_v38 = vpack.c.bf16 %v799_v25, %v795_v13  ;;  %v738_v39 = vadd.f32 %v737_v33, %v3637_v30  ;;  %v3071_v61 = vld [vmem:[#allocation4 + $0x170] ss:$8 sps:$4 sm:$0xff]   ;;  %1720 = vmatprep.subr.bf16.mxu1 %v3133_v57  ;;  %v3134_v33 = vld [vmem:[%s4082_s5 + $0xc0] ss:$8 sps:$4 sm:$0xff]  }
 0x162   : > { %v599_v9 = vadd.f32 %v598_v3, %v3618_v15  ;;  %v600_v12 = vpop.f32.mrb[15].mxu0  ;;  %1305 = vmatmul.mubr.bf16.gmra.mrb[36].mxu0 %v836_v55  ;;  %v802_v47 = vmax.f32 %v736_v32, 0.0 }
 0x163   : > { %1362 = vmatpush1.bf16.msra.mxu0 %v3062_v63  ;;  %v601_v19 = vadd.f32 %v600_v12, %v3621_v17  ;;  %v741_v45 = vpop.f32.mrb[14].mxu1  ;;  %v803_v55 = vmax.f32 %v738_v39, 0.0 }
 0x164   : > { %v804_v23 = vmax.f32 %v599_v9, 0.0  ;;  %1363 = vmatprep.subr.bf16.mxu0 %v3067_v1  ;;  %v742_v48 = vadd.f32 %v741_v45, %v3631_v26  ;;  %v743_v49 = vpop.f32.mrb[15].mxu1  ;;  %v3076_v1 = vld [vmem:[#allocation4 + $0x184] ss:$8 sps:$4 sm:$0xff]   ;;  %v3131_v9 = vld [vmem:[%s4082_s5 + $0xb0] ss:$8 sps:$4 sm:$0xff]  }
 0x165   : > { %v805_v28 = vmax.f32 %v601_v19, 0.0  ;;  %v604_v29 = vpop.f32.mrb[16].mxu0  ;;  %v744_v56 = vadd.f32 %v743_v49, %v3637_v30  ;;  %v3136_v19 = vld [vmem:[%s4082_s5 + $0xc4] ss:$8 sps:$4 sm:$0xff]   ;;  %1721 = vmatpush1.bf16.msra.mxu1 %v3131_v9 }
 0x166   : > { %v840_v35 = vpack.c.bf16 %v804_v23, %v800_v8  ;;  %v605_v36 = vadd.f32 %v604_v29, %v3618_v15  ;;  %v606_v37 = vpop.f32.mrb[17].mxu0  ;;  %v806_v62 = vmax.f32 %v742_v48, 0.0  ;;  %v3074_v23 = vld [vmem:[#allocation4 + $0x180] ss:$8 sps:$4 sm:$0xff]   ;;  %1722 = vmatprep.subr.bf16.mxu1 %v3136_v19 }
 0x167   : > { %v841_v41 = vpack.c.bf16 %v805_v28, %v801_v18  ;;  %1364 = vmatpush1.bf16.msra.mxu0 %v3065_v21  ;;  %v607_v42 = vadd.f32 %v606_v37, %v3621_v17  ;;  %v807_v2 = vmax.f32 %v744_v56, 0.0  ;;  %v747_v3 = vpop.f32.mrb[16].mxu1 }
 0x168   : > { %1365 = vmatprep.subr.bf16.mxu0 %v3070_v24  ;;  %v808_v52 = vmax.f32 %v605_v36, 0.0  ;;  %v3735_v6 = vpack.c.bf16 %v806_v62, %v802_v47  ;;  %v748_v7 = vadd.f32 %v747_v3, %v3631_v26  ;;  %v749_v8 = vpop.f32.mrb[17].mxu1  ;;  %v3079_v24 = vld [vmem:[#allocation4 + $0x194] ss:$8 sps:$4 sm:$0xff]  }
 0x169   : > { %v610_v46 = vpop.f32.mrb[18].mxu0  ;;  %1314 = vmatprep.mubr.bf16.mxu0 %v841_v41  ;;  %v809_v59 = vmax.f32 %v607_v42, 0.0  ;;  %v3742_v16 = vpack.c.bf16 %v807_v2, %v803_v55  ;;  %v750_v18 = vadd.f32 %v749_v8, %v3637_v30  ;;  %1723 = vmatpush1.bf16.msra.mxu1 %v3134_v33  ;;  %v3137_v55 = vld [vmem:[%s4082_s5 + $0xd0] ss:$8 sps:$4 sm:$0xff]   ;;  %v3085_v2 = vld [vmem:[#allocation4 + $0x1b4] ss:$8 sps:$4 sm:$0xff]  }
 0x16a   : > { %v611_v53 = vadd.f32 %v610_v46, %v3618_v15  ;;  %v612_v54 = vpop.f32.mrb[19].mxu0  ;;  %1315 = vmatmul.mubr.bf16.gmra.mrb[40].mxu0 %v840_v35  ;;  %v810_v28 = vmax.f32 %v748_v7, 0.0  ;;  %v3082_v46 = vld [vmem:[#allocation4 + $0x1a4] ss:$8 sps:$4 sm:$0xff]   ;;  %1724 = vmatprep.subr.bf16.mxu1 %v3139_v40  ;;  %v3092_v33 = vld [vmem:[#allocation4 + $0x1e0] ss:$8 sps:$4 sm:$0xff]  }
 0x16b   : > { %1366 = vmatpush1.bf16.msra.mxu0 %v3068_v43  ;;  %v613_v60 = vadd.f32 %v612_v54, %v3621_v17  ;;  %v753_v25 = vpop.f32.mrb[18].mxu1  ;;  %v811_v37 = vmax.f32 %v750_v18, 0.0  ;;  %v3077_v43 = vld [vmem:[#allocation4 + $0x190] ss:$8 sps:$4 sm:$0xff]  }
 0x16c   : > { %v812_v63 = vmax.f32 %v611_v53, 0.0  ;;  %1367 = vmatprep.subr.bf16.mxu0 %v3073_v44  ;;  %v754_v29 = vadd.f32 %v753_v25, %v3631_v26  ;;  %v755_v32 = vpop.f32.mrb[19].mxu1 }
 0x16d   : > { %v813_v4 = vmax.f32 %v613_v60, 0.0  ;;  %v616_v5 = vpop.f32.mrb[20].mxu0  ;;  %v756_v39 = vadd.f32 %v755_v32, %v3637_v30  ;;  %1725 = vmatpush1.bf16.msra.mxu1 %v3137_v55  ;;  %v3094_v32 = vld [vmem:[#allocation4 + $0x1e4] ss:$8 sps:$4 sm:$0xff]  }
 0x16e   : > { %v844_v12 = vpack.c.bf16 %v812_v63, %v808_v52  ;;  %v617_v13 = vadd.f32 %v616_v5, %v3618_v15  ;;  %v618_v14 = vpop.f32.mrb[21].mxu0  ;;  %v814_v44 = vmax.f32 %v754_v29, 0.0  ;;  %v3080_v63 = vld [vmem:[#allocation4 + $0x1a0] ss:$8 sps:$4 sm:$0xff]   ;;  %v3089_v29 = vld [vmem:[#allocation4 + $0x1d0] ss:$8 sps:$4 sm:$0xff]  }
 0x16f   : > { %v845_v21 = vpack.c.bf16 %v813_v4, %v809_v59  ;;  %1368 = vmatpush1.bf16.msra.mxu0 %v3071_v61  ;;  %v619_v22 = vadd.f32 %v618_v14, %v3621_v17  ;;  %v815_v47 = vmax.f32 %v756_v39, 0.0  ;;  %v759_v48 = vpop.f32.mrb[20].mxu1 }
 0x170   : > { %1369 = vmatprep.subr.bf16.mxu0 %v3076_v1  ;;  %v816_v34 = vmax.f32 %v617_v13, 0.0  ;;  %v3759_v52 = vpack.c.bf16 %v814_v44, %v810_v28  ;;  %v760_v53 = vadd.f32 %v759_v48, %v3631_v26  ;;  %v761_v54 = vpop.f32.mrb[21].mxu1  ;;  %v3083_v13 = vld [vmem:[#allocation4 + $0x1b0] ss:$8 sps:$4 sm:$0xff]   ;;  %v3091_v28 = vld [vmem:[#allocation4 + $0x1d4] ss:$8 sps:$4 sm:$0xff]  }
 0x171   : > { %v622_v27 = vpop.f32.mrb[22].mxu0  ;;  %1324 = vmatprep.mubr.bf16.mxu0 %v845_v21  ;;  %v817_v41 = vmax.f32 %v619_v22, 0.0  ;;  %v847_v60 = vpack.c.bf16 %v815_v47, %v811_v37  ;;  %v762_v61 = vadd.f32 %v761_v54, %v3637_v30 }
 0x172   : > { %v623_v35 = vadd.f32 %v622_v27, %v3618_v15  ;;  %v624_v36 = vpop.f32.mrb[23].mxu0  ;;  %1325 = vmatmul.mubr.bf16.gmra.mrb[44].mxu0 %v844_v12  ;;  %v818_v5 = vmax.f32 %v760_v53, 0.0  ;;  %v3086_v27 = vld [vmem:[#allocation4 + $0x1c0] ss:$8 sps:$4 sm:$0xff]  }
 0x173   : > { %1370 = vmatpush1.bf16.msra.mxu0 %v3074_v23  ;;  %v625_v42 = vadd.f32 %v624_v36, %v3621_v17  ;;  %v765_v3 = vpop.f32.mrb[22].mxu1  ;;  %v819_v9 = vmax.f32 %v762_v61, 0.0  ;;  %v3148_v61 = vld [vmem:[#allocation6 + $0x48] sm:$0xff]  }
 0x174   : > { %v820_v45 = vmax.f32 %v623_v35, 0.0  ;;  %1371 = vmatprep.subr.bf16.mxu0 %v3079_v24  ;;  %v766_v7 = vadd.f32 %v765_v3, %v3631_v26  ;;  %v767_v8 = vpop.f32.mrb[23].mxu1  ;;  %v3095_v35 = vld [vmem:[#allocation4 + $0x1f0] ss:$8 sps:$4 sm:$0xff]  }
 0x175   : > { %v821_v49 = vmax.f32 %v625_v42, 0.0  ;;  %v628_v50 = vpop.f32.mrb[24].mxu0  ;;  %v768_v12 = vadd.f32 %v767_v8, %v3637_v30  ;;  %v3150_v8 = vld [vmem:[#allocation6 + $0x50] sm:$0xff]  }
 0x176   : > { %v848_v56 = vpack.c.bf16 %v820_v45, %v816_v34  ;;  %v629_v57 = vadd.f32 %v628_v50, %v3618_v15  ;;  %v630_v59 = vpop.f32.mrb[25].mxu0  ;;  %v822_v18 = vmax.f32 %v766_v7, 0.0  ;;  %v3097_v34 = vld [vmem:[#allocation4 + $0x1f4] ss:$8 sps:$4 sm:$0xff]  }
 0x177   : > { %v849_v62 = vpack.c.bf16 %v821_v49, %v817_v41  ;;  %1372 = vmatpush1.bf16.msra.mxu0 %v3077_v43  ;;  %v631_v1 = vadd.f32 %v630_v59, %v3621_v17  ;;  %v3088_v17 = vld [vmem:[#allocation4 + $0x1c4] ss:$8 sps:$4 sm:$0xff]   ;;  %v823_v19 = vmax.f32 %v768_v12, 0.0  ;;  %v771_v21 = vpop.f32.mrb[24].mxu1 }
 0x178   : > { %1373 = vmatprep.subr.bf16.mxu0 %v3082_v46  ;;  %v824_v15 = vmax.f32 %v629_v57, 0.0  ;;  %v850_v22 = vpack.c.bf16 %v822_v18, %v818_v5  ;;  %v773_v23 = vpop.f32.mrb[25].mxu1  ;;  %v3147_v57 = vld [vmem:[#allocation6] sm:$0xff]   ;;  %v3151_v18 = vld [vmem:[#allocation6 + $0x10] sm:$0xff]  }
 0x179   : > { %1334 = vmatprep.mubr.bf16.mxu0 %v849_v62  ;;  %v825_v4 = vmax.f32 %v631_v1, 0.0  ;;  %v851_v25 = vpack.c.bf16 %v823_v19, %v819_v9 }
 0x17a   : > { %1335 = vmatmul.mubr.bf16.gmra.mrb[48].mxu0 %v848_v56  ;;  %v852_v24 = vpack.c.bf16 %v824_v15, %v824_v15 }
 0x17b   : > { %1374 = vmatpush1.bf16.msra.mxu0 %v3080_v63  ;;  %v853_v14 = vpack.c.bf16 %v825_v4, %v825_v4  ;;  %v3149_v4 = vld [vmem:[#allocation6 + $0x8] sm:$0xff]  }
 0x17c   : > { %1375 = vmatprep.subr.bf16.mxu0 %v3085_v2 }
 0x17d   : > { %1344 = vmatprep.mubr.bf16.mxu0 %v853_v14 }
 0x17f   : > { %1376 = vmatpush1.bf16.msra.mxu0 %v3083_v13 }
 0x180   : > { %1377 = vmatprep.subr.bf16.mxu0 %v3088_v17 }
 0x182   : > { %1345 = vmatmul.mubr.bf16.gmra.mrb[52].mxu0 %v852_v24 }
 0x183   : > { %1378 = vmatpush1.bf16.msra.mxu0 %v3086_v27  ;;  %1385 = vmatprep.mubr.bf16.mxu0 %v3670_v20  ;;  %v774_v20 = vadd.f32 %v773_v23, %v3637_v30  ;;  %v3140_v30 = vld [vmem:[%s4082_s5 + $0xe0] ss:$8 sps:$4 sm:$0xff]  }
 0x184   : > { %1379 = vmatprep.subr.bf16.mxu0 %v3091_v28  ;;  %v3153_v28 = vld [vmem:[#allocation6 + $0x18] sm:$0xff]  }
 0x185   : > { %v827_v36 = vmax.f32 %v774_v20, 0.0 }
 0x187   : > { %1380 = vmatpush1.bf16.msra.mxu0 %v3089_v29 }
 0x188   : > { %1381 = vmatprep.subr.bf16.mxu0 %v3094_v32 }
 0x18b   : > { %1382 = vmatpush1.bf16.msra.mxu0 %v3092_v33  ;;  %v3154_v33 = vld [vmem:[#allocation6 + $0x60] sm:$0xff]  }
 0x18c   : > { %1383 = vmatprep.subr.bf16.mxu0 %v3097_v34 }
 0x18f   : > { %1384 = vmatpush1.bf16.msra.mxu0 %v3095_v35 }
 0x192   : > { %1386 = vmatmul.mubr.bf16.vlgmr.msra.gmra.mrb[28].mxu0 %v3663_v0  ;;  %v772_v0 = vadd.f32 %v771_v21, %v3631_v26  ;;  %v3145_v26 = vld [vmem:[%s4082_s5 + $0xf4] ss:$8 sps:$4 sm:$0xff]  }
 0x193   : > { %1395 = vmatprep.mubr.bf16.mxu0 %v3694_v58  ;;  %v855_v58 = vpack.c.bf16 %v827_v36, %v827_v36  ;;  %v3152_v21 = vld [vmem:[#allocation6 + $0x58] sm:$0xff]  }
 0x194   : > { %v826_v37 = vmax.f32 %v772_v0, 0.0 }
 0x19a   : > { %1396 = vmatmul.mubr.bf16.gmra.mrb[32].mxu0 %v3687_v51  ;;  %v854_v51 = vpack.c.bf16 %v826_v37, %v826_v37 }
 0x19b   : > { %1405 = vmatprep.mubr.bf16.mxu0 %v3718_v38  ;;  %v3143_v38 = vld [vmem:[%s4082_s5 + $0xf0] ss:$8 sps:$4 sm:$0xff]  }
 0x1a2   : > { %1406 = vmatmul.mubr.bf16.gmra.mrb[36].mxu0 %v3711_v31  ;;  %v3142_v31 = vld [vmem:[%s4082_s5 + $0xe4] ss:$8 sps:$4 sm:$0xff]  }
 0x1a3   : > { %1415 = vmatprep.mubr.bf16.mxu0 %v3742_v16  ;;  %1726 = vmatprep.subr.bf16.mxu1 %v3142_v31  ;;  %v920_v16 = vld [vmem:[%s4081_s4] sm:$0x3]  ;;  %v3156_v31 = vld [vmem:[#allocation6 + $0x68] sm:$0xff]  }
 0x1a4   : > { %1727 = vmatpush1.bf16.msra.mxu1 %v3140_v30  ;;  %v3797_v39 = vrot.slane %v920_v16, %v3601_v10  ;;  %v3800_v40 = vrot.slane %v920_v16, %v3606_v11 }
 0x1a5   : > { %1728 = vmatprep.subr.bf16.mxu1 %v3145_v26 }
 0x1a8   : > { %1729 = vmatpush1.bf16.msra.mxu1 %v3143_v38 }
 0x1aa   : > { %1416 = vmatmul.mubr.bf16.gmra.mrb[40].mxu0 %v3735_v6  ;;  %v3146_v6 = vld [vmem:[#allocation6 + $0x40] sm:$0xff]  }
 0x1ab   : > { %1425 = vmatprep.mubr.bf16.mxu0 %v847_v60  ;;  %2743 = vmatprep.subr.bf16.mxu1 %v3146_v6 }
 0x1b2   : > { %1426 = vmatmul.mubr.bf16.gmra.mrb[44].mxu0 %v3759_v52 }
 0x1b3   : > { %1435 = vmatprep.mubr.bf16.mxu0 %v851_v25 }
 0x1ba   : > { %1436 = vmatmul.mubr.bf16.gmra.mrb[48].mxu0 %v850_v22 }
 0x1bb   : > { %1445 = vmatprep.mubr.bf16.mxu0 %v855_v58  ;;  %v3155_v58 = vld [vmem:[#allocation6 + $0x20] sm:$0xff]  }
 0x1c2   : > { %1446 = vmatmul.mubr.bf16.gmra.mrb[52].mxu0 %v854_v51 }
 0x265   : > { %v1387_v41 = vpop.f32.mrb[28].mxu0 }
 0x266   : > { %v2817_v42 = vadd.f32 %v1387_v41, %v3797_v39  ;;  %v1389_v43 = vpop.f32.mrb[29].mxu0  ;;  %v3157_v41 = vld [vmem:[#allocation6 + $0x28] sm:$0xff]  }
 0x267   : > { %v2818_v44 = vadd.f32 %v1389_v43, %v3800_v40  ;;  %v1391_v45 = vpop.f32.mrb[30].mxu0 }
 0x268   : > { %v2819_v46 = vadd.f32 %v1391_v45, %v3797_v39  ;;  %v1393_v47 = vpop.f32.mrb[31].mxu0  ;;  %v1454_v49 = vmax.f32 %v2817_v42, 0.0 }
 0x269   : > { %v2820_v48 = vadd.f32 %v1393_v47, %v3800_v40  ;;  %v1455_v52 = vmax.f32 %v2818_v44, 0.0  ;;  %v3158_v44 = vld [vmem:[#allocation6 + $0x70] sm:$0xff]  }
 0x26a   : > { %v1456_v50 = vmax.f32 %v2819_v46, 0.0 }
 0x26b   : > { %v1457_v53 = vmax.f32 %v2820_v48, 0.0 }
 0x26c   : > { %v1480_v54 = vpack.c.bf16 %v1456_v50, %v1454_v49  ;;  %v3159_v50 = vld [vmem:[#allocation6 + $0x30] sm:$0xff]  }
 0x26d   : > { %v1481_v55 = vpack.c.bf16 %v1457_v53, %v1455_v52  ;;  %v1397_v56 = vpop.f32.mrb[32].mxu0 }
 0x26e   : > { %v2821_v59 = vadd.f32 %v1397_v56, %v3797_v39  ;;  %v1399_v60 = vpop.f32.mrb[33].mxu0 }
 0x26f   : > { %v2822_v62 = vadd.f32 %v1399_v60, %v3800_v40  ;;  %v1401_v63 = vpop.f32.mrb[34].mxu0  ;;  %1730 = vmatprep.mubr.bf16.mxu1 %v1481_v55 }
 0x270   : > { %v2823_v1 = vadd.f32 %v1401_v63, %v3797_v39  ;;  %v1403_v2 = vpop.f32.mrb[35].mxu0  ;;  %1731 = vmatmul.mubr.bf16.vlgmr.msra.gmra.mrb[28].mxu1 %v1480_v54  ;;  %v1458_v5 = vmax.f32 %v2821_v59, 0.0 }
 0x271   : > { %v2824_v3 = vadd.f32 %v1403_v2, %v3800_v40  ;;  %2744 = vmatpush3.bf16.msra.mxu1 %v3147_v57  ;;  %v1459_v15 = vmax.f32 %v2822_v62, 0.0 }
 0x272   : > { %v1460_v7 = vmax.f32 %v2823_v1, 0.0  ;;  %2745 = vmatprep.subr.bf16.mxu1 %v3148_v61 }
 0x273   : > { %v1461_v9 = vmax.f32 %v2824_v3, 0.0 }
 0x274   : > { %v1482_v12 = vpack.c.bf16 %v1460_v7, %v1458_v5 }
 0x275   : > { %v1483_v13 = vpack.c.bf16 %v1461_v9, %v1459_v15  ;;  %v1407_v14 = vpop.f32.mrb[36].mxu0  ;;  %2746 = vmatpush3.bf16.msra.mxu1 %v3149_v4 }
 0x276   : > { %v2825_v17 = vadd.f32 %v1407_v14, %v3797_v39  ;;  %v1409_v19 = vpop.f32.mrb[37].mxu0  ;;  %2747 = vmatprep.subr.bf16.mxu1 %v3150_v8 }
 0x277   : > { %v2826_v22 = vadd.f32 %v1409_v19, %v3800_v40  ;;  %v1411_v23 = vpop.f32.mrb[38].mxu0  ;;  %1740 = vmatprep.mubr.bf16.mxu1 %v1483_v13 }
 0x278   : > { %v2827_v24 = vadd.f32 %v1411_v23, %v3797_v39  ;;  %v1413_v25 = vpop.f32.mrb[39].mxu0  ;;  %1741 = vmatmul.mubr.bf16.gmra.mrb[32].mxu1 %v1482_v12  ;;  %v1462_v29 = vmax.f32 %v2825_v17, 0.0 }
 0x279   : > { %v2828_v27 = vadd.f32 %v1413_v25, %v3800_v40  ;;  %2748 = vmatpush3.bf16.msra.mxu1 %v3151_v18  ;;  %v1463_v34 = vmax.f32 %v2826_v22, 0.0 }
 0x27a   : > { %v1464_v32 = vmax.f32 %v2827_v24, 0.0  ;;  %2749 = vmatprep.subr.bf16.mxu1 %v3152_v21 }
 0x27b   : > { %v1465_v35 = vmax.f32 %v2828_v27, 0.0 }
 0x27c   : > { %v1484_v20 = vpack.c.bf16 %v1464_v32, %v1462_v29 }
 0x27d   : > { %v1485_v36 = vpack.c.bf16 %v1465_v35, %v1463_v34  ;;  %v1417_v0 = vpop.f32.mrb[40].mxu0  ;;  %2750 = vmatpush3.bf16.msra.mxu1 %v3153_v28  ;;  %v3160_v35 = vld [vmem:[#allocation6 + $0x78] sm:$0xff]  }
 0x27e   : > { %v2829_v37 = vadd.f32 %v1417_v0, %v3797_v39  ;;  %v1419_v51 = vpop.f32.mrb[41].mxu0  ;;  %2751 = vmatprep.subr.bf16.mxu1 %v3154_v33 }
 0x27f   : > { %v2830_v30 = vadd.f32 %v1419_v51, %v3800_v40  ;;  %v1421_v26 = vpop.f32.mrb[42].mxu0  ;;  %1750 = vmatprep.mubr.bf16.mxu1 %v1485_v36 }
 0x280   : > { %v2831_v38 = vadd.f32 %v1421_v26, %v3797_v39  ;;  %v1423_v6 = vpop.f32.mrb[43].mxu0  ;;  %1751 = vmatmul.mubr.bf16.gmra.mrb[36].mxu1 %v1484_v20  ;;  %v1466_v42 = vmax.f32 %v2829_v37, 0.0  ;;  %v3161_v20 = vld [vmem:[#allocation6 + $0x38] sm:$0xff]  }
 0x281   : > { %v2832_v16 = vadd.f32 %v1423_v6, %v3800_v40  ;;  %2752 = vmatpush3.bf16.msra.mxu1 %v3155_v58  ;;  %v1467_v45 = vmax.f32 %v2830_v30, 0.0 }
 0x282   : > { %v1468_v43 = vmax.f32 %v2831_v38, 0.0  ;;  %2753 = vmatprep.subr.bf16.mxu1 %v3156_v31 }
 0x283   : > { %v1469_v46 = vmax.f32 %v2832_v16, 0.0 }
 0x284   : > { %v1486_v47 = vpack.c.bf16 %v1468_v43, %v1466_v42 }
 0x285   : > { %v1487_v48 = vpack.c.bf16 %v1469_v46, %v1467_v45  ;;  %v1427_v49 = vpop.f32.mrb[44].mxu0  ;;  %2754 = vmatpush3.bf16.msra.mxu1 %v3157_v41 }
 0x286   : > { %v2833_v52 = vadd.f32 %v1427_v49, %v3797_v39  ;;  %v1429_v53 = vpop.f32.mrb[45].mxu0  ;;  %2755 = vmatprep.subr.bf16.mxu1 %v3158_v44 }
 0x287   : > { %v2834_v54 = vadd.f32 %v1429_v53, %v3800_v40  ;;  %v1431_v55 = vpop.f32.mrb[46].mxu0  ;;  %1760 = vmatprep.mubr.bf16.mxu1 %v1487_v48 }
 0x288   : > { %v2835_v56 = vadd.f32 %v1431_v55, %v3797_v39  ;;  %v1433_v57 = vpop.f32.mrb[47].mxu0  ;;  %1761 = vmatmul.mubr.bf16.gmra.mrb[40].mxu1 %v1486_v47  ;;  %v1470_v60 = vmax.f32 %v2833_v52, 0.0 }
 0x289   : > { %v2836_v59 = vadd.f32 %v1433_v57, %v3800_v40  ;;  %2756 = vmatpush3.bf16.msra.mxu1 %v3159_v50  ;;  %v1471_v62 = vmax.f32 %v2834_v54, 0.0 }
 0x28a   : > { %v1472_v61 = vmax.f32 %v2835_v56, 0.0  ;;  %2757 = vmatprep.subr.bf16.mxu1 %v3160_v35 }
 0x28b   : > { %v1473_v63 = vmax.f32 %v2836_v59, 0.0 }
 0x28c   : > { %v1488_v1 = vpack.c.bf16 %v1472_v61, %v1470_v60 }
 0x28d   : > { %v1489_v2 = vpack.c.bf16 %v1473_v63, %v1471_v62  ;;  %v1437_v3 = vpop.f32.mrb[48].mxu0  ;;  %2758 = vmatpush3.bf16.msra.mxu1 %v3161_v20 }
 0x28e   : > { %v2837_v4 = vadd.f32 %v1437_v3, %v3797_v39  ;;  %v1439_v5 = vpop.f32.mrb[49].mxu0 }
 0x28f   : > { %v2838_v7 = vadd.f32 %v1439_v5, %v3800_v40  ;;  %v1441_v8 = vpop.f32.mrb[50].mxu0  ;;  %1770 = vmatprep.mubr.bf16.mxu1 %v1489_v2 }
 0x290   : > { %v2839_v15 = vadd.f32 %v1441_v8, %v3797_v39  ;;  %v1443_v9 = vpop.f32.mrb[51].mxu0  ;;  %1771 = vmatmul.mubr.bf16.gmra.mrb[44].mxu1 %v1488_v1  ;;  %v1474_v13 = vmax.f32 %v2837_v4, 0.0 }
 0x291   : > { %v2840_v12 = vadd.f32 %v1443_v9, %v3800_v40  ;;  %v1475_v18 = vmax.f32 %v2838_v7, 0.0 }
 0x292   : > { %v1476_v14 = vmax.f32 %v2839_v15, 0.0 }
 0x293   : > { %v1477_v17 = vmax.f32 %v2840_v12, 0.0 }
 0x294   : > { %v1490_v19 = vpack.c.bf16 %v1476_v14, %v1474_v13 }
 0x295   : > { %v1491_v21 = vpack.c.bf16 %v1477_v17, %v1475_v18  ;;  %v1447_v22 = vpop.f32.mrb[52].mxu0 }
 0x296   : > { %v2841_v23 = vadd.f32 %v1447_v22, %v3797_v39  ;;  %v1449_v24 = vpop.f32.mrb[53].mxu0  ;;  %v1526_v39 = vld [vmem:[%s4083_s6] sm:$0x3] }
 0x297   : > { %v2842_v25 = vadd.f32 %v1449_v24, %v3800_v40  ;;  %v1451_v27 = vpop.f32.mrb[54].mxu0  ;;  %1780 = vmatprep.mubr.bf16.mxu1 %v1491_v21  ;;  %v3832_v40 = vrot.slane %v1526_v39, %v3601_v10  ;;  %v3835_v36 = vrot.slane %v1526_v39, %v3606_v11 }
 0x298   : > { %v1452_v28 = vpop.f32.mrb[55].mxu0  ;;  %1781 = vmatmul.mubr.bf16.gmra.mrb[48].mxu1 %v1490_v19  ;;  %v1478_v32 = vmax.f32 %v2841_v23, 0.0 }
 0x299   : > { %v1479_v29 = vmax.f32 %v2842_v25, 0.0 }
 0x29a   : > { %v1492_v34 = vpack.c.bf16 %v1478_v32, %v1478_v32 }
 0x29b   : > { %v1493_v33 = vpack.c.bf16 %v1479_v29, %v1479_v29 }
 0x29d   : > { %1790 = vmatprep.mubr.bf16.mxu1 %v1493_v33 }
 0x2a0   : > { %1791 = vmatmul.mubr.bf16.gmra.mrb[52].mxu1 %v1492_v34 }
 0x343   : > { %v1732_v0 = vpop.f32.mrb[28].mxu1 }
 0x344   : > { %v1733_v58 = vadd.f32 %v1732_v0, %v3832_v40  ;;  %v1734_v37 = vpop.f32.mrb[29].mxu1 }
 0x345   : > { %v1735_v51 = vadd.f32 %v1734_v37, %v3835_v36  ;;  %v1736_v31 = vpop.f32.mrb[30].mxu1 }
 0x346   : > { %v1737_v30 = vadd.f32 %v1736_v31, %v3832_v40  ;;  %v1738_v26 = vpop.f32.mrb[31].mxu1  ;;  %v1799_v6 = vmax.f32 %v1733_v58, 0.0 }
 0x347   : > { %v1739_v38 = vadd.f32 %v1738_v26, %v3835_v36  ;;  %v1800_v41 = vmax.f32 %v1735_v51, 0.0 }
 0x348   : > { %v1801_v16 = vmax.f32 %v1737_v30, 0.0 }
 0x349   : > { %v1802_v10 = vmax.f32 %v1739_v38, 0.0 }
 0x34a   : > { %v1825_v42 = vpack.c.bf16 %v1801_v16, %v1799_v6 }
 0x34b   : > { %v1826_v43 = vpack.c.bf16 %v1802_v10, %v1800_v41  ;;  %v1742_v11 = vpop.f32.mrb[32].mxu1 }
 0x34c   : > { %v1743_v44 = vadd.f32 %v1742_v11, %v3832_v40  ;;  %v1744_v45 = vpop.f32.mrb[33].mxu1 }
 0x34d   : > { %v1745_v46 = vadd.f32 %v1744_v45, %v3835_v36  ;;  %v1746_v47 = vpop.f32.mrb[34].mxu1  ;;  %2006 = vmatprep.mubr.bf16.mxu1 %v1826_v43 }
 0x34e   : > { %v1747_v48 = vadd.f32 %v1746_v47, %v3832_v40  ;;  %v1748_v49 = vpop.f32.mrb[35].mxu1  ;;  %2007 = vmatmul.mubr.bf16.vlgmr.msra.gmra.mrb[56].mxu1 %v1825_v42  ;;  %v1803_v52 = vmax.f32 %v1743_v44, 0.0 }
 0x34f   : > { %v1749_v50 = vadd.f32 %v1748_v49, %v3835_v36  ;;  %v1804_v54 = vmax.f32 %v1745_v46, 0.0 }
 0x350   : > { %v1805_v53 = vmax.f32 %v1747_v48, 0.0 }
 0x351   : > { %v1806_v55 = vmax.f32 %v1749_v50, 0.0 }
 0x352   : > { %v1827_v56 = vpack.c.bf16 %v1805_v53, %v1803_v52 }
 0x353   : > { %v1828_v57 = vpack.c.bf16 %v1806_v55, %v1804_v54  ;;  %v1752_v59 = vpop.f32.mrb[36].mxu1 }
 0x354   : > { %v1753_v60 = vadd.f32 %v1752_v59, %v3832_v40  ;;  %v1754_v61 = vpop.f32.mrb[37].mxu1 }
 0x355   : > { %v1755_v62 = vadd.f32 %v1754_v61, %v3835_v36  ;;  %v1756_v63 = vpop.f32.mrb[38].mxu1  ;;  %2014 = vmatprep.mubr.bf16.mxu1 %v1828_v57 }
 0x356   : > { %v1757_v1 = vadd.f32 %v1756_v63, %v3832_v40  ;;  %v1758_v2 = vpop.f32.mrb[39].mxu1  ;;  %2015 = vmatmul.mubr.bf16.gmra.mrb[60].mxu1 %v1827_v56  ;;  %v1807_v4 = vmax.f32 %v1753_v60, 0.0  ;;  %v3356_v63 = vmov 127  }
 0x357   : > { %v1759_v3 = vadd.f32 %v1758_v2, %v3835_v36  ;;  %v1808_v7 = vmax.f32 %v1755_v62, 0.0  ;;  %3000 = vset.pattern.permute.xlu1 %v3356_v63  ;;  %3001 = vset.pattern.permute.xlu0 %v3356_v63 }
 0x358   : > { %v1809_v5 = vmax.f32 %v1757_v1, 0.0 }
 0x359   : > { %v1810_v8 = vmax.f32 %v1759_v3, 0.0 }
 0x35a   : > { %v1829_v15 = vpack.c.bf16 %v1809_v5, %v1807_v4 }
 0x35b   : > { %v1830_v9 = vpack.c.bf16 %v1810_v8, %v1808_v7  ;;  %v1762_v12 = vpop.f32.mrb[40].mxu1 }
 0x35c   : > { %v1763_v13 = vadd.f32 %v1762_v12, %v3832_v40  ;;  %v1764_v14 = vpop.f32.mrb[41].mxu1 }
 0x35d   : > { %v1765_v18 = vadd.f32 %v1764_v14, %v3835_v36  ;;  %v1766_v17 = vpop.f32.mrb[42].mxu1  ;;  %2022 = vmatprep.mubr.bf16.mxu1 %v1830_v9 }
 0x35e   : > { %v1767_v19 = vadd.f32 %v1766_v17, %v3832_v40  ;;  %v1768_v21 = vpop.f32.mrb[43].mxu1  ;;  %2023 = vmatmul.mubr.bf16.gmra.mrb[64].mxu1 %v1829_v15  ;;  %v1811_v23 = vmax.f32 %v1763_v13, 0.0 }
 0x35f   : > { %v1769_v22 = vadd.f32 %v1768_v21, %v3835_v36  ;;  %v1812_v25 = vmax.f32 %v1765_v18, 0.0 }
 0x360   : > { %v1813_v24 = vmax.f32 %v1767_v19, 0.0 }
 0x361   : > { %v1814_v27 = vmax.f32 %v1769_v22, 0.0 }
 0x362   : > { %v1831_v28 = vpack.c.bf16 %v1813_v24, %v1811_v23 }
 0x363   : > { %v1832_v29 = vpack.c.bf16 %v1814_v27, %v1812_v25  ;;  %v1772_v32 = vpop.f32.mrb[44].mxu1 }
 0x364   : > { %v1773_v33 = vadd.f32 %v1772_v32, %v3832_v40  ;;  %v1774_v34 = vpop.f32.mrb[45].mxu1 }
 0x365   : > { %v1775_v35 = vadd.f32 %v1774_v34, %v3835_v36  ;;  %v1776_v20 = vpop.f32.mrb[46].mxu1  ;;  %2030 = vmatprep.mubr.bf16.mxu1 %v1832_v29 }
 0x366   : > { %v1777_v39 = vadd.f32 %v1776_v20, %v3832_v40  ;;  %v1778_v0 = vpop.f32.mrb[47].mxu1  ;;  %2031 = vmatmul.mubr.bf16.gmra.mrb[68].mxu1 %v1831_v28  ;;  %v1815_v37 = vmax.f32 %v1773_v33, 0.0 }
 0x367   : > { %v1779_v58 = vadd.f32 %v1778_v0, %v3835_v36  ;;  %v1816_v31 = vmax.f32 %v1775_v35, 0.0 }
 0x368   : > { %v1817_v51 = vmax.f32 %v1777_v39, 0.0 }
 0x369   : > { %v1818_v30 = vmax.f32 %v1779_v58, 0.0 }
 0x36a   : > { %v1833_v26 = vpack.c.bf16 %v1817_v51, %v1815_v37 }
 0x36b   : > { %v1834_v38 = vpack.c.bf16 %v1818_v30, %v1816_v31  ;;  %v1782_v6 = vpop.f32.mrb[48].mxu1 }
 0x36c   : > { %v1783_v16 = vadd.f32 %v1782_v6, %v3832_v40  ;;  %v1784_v41 = vpop.f32.mrb[49].mxu1 }
 0x36d   : > { %v1785_v10 = vadd.f32 %v1784_v41, %v3835_v36  ;;  %v1786_v42 = vpop.f32.mrb[50].mxu1  ;;  %2038 = vmatprep.mubr.bf16.mxu1 %v1834_v38 }
 0x36e   : > { %v1787_v43 = vadd.f32 %v1786_v42, %v3832_v40  ;;  %v1788_v11 = vpop.f32.mrb[51].mxu1  ;;  %2039 = vmatmul.mubr.bf16.gmra.mrb[72].mxu1 %v1833_v26  ;;  %v1819_v45 = vmax.f32 %v1783_v16, 0.0 }
 0x36f   : > { %v1789_v44 = vadd.f32 %v1788_v11, %v3835_v36  ;;  %v1820_v47 = vmax.f32 %v1785_v10, 0.0 }
 0x370   : > { %v1821_v46 = vmax.f32 %v1787_v43, 0.0 }
 0x371   : > { %v1822_v48 = vmax.f32 %v1789_v44, 0.0 }
 0x372   : > { %v1835_v49 = vpack.c.bf16 %v1821_v46, %v1819_v45 }
 0x373   : > { %v1836_v50 = vpack.c.bf16 %v1822_v48, %v1820_v47  ;;  %v1792_v52 = vpop.f32.mrb[52].mxu1 }
 0x374   : > { %v1793_v53 = vadd.f32 %v1792_v52, %v3832_v40  ;;  %v1794_v54 = vpop.f32.mrb[53].mxu1  ;;  %v3866_v40 = vld [vmem:[%s4085_s8] ss:$0 sm:$0xff] }
 0x375   : > { %v1795_v55 = vadd.f32 %v1794_v54, %v3835_v36  ;;  %v1796_v56 = vpop.f32.mrb[54].mxu1  ;;  %2046 = vmatprep.mubr.bf16.mxu1 %v1836_v50 }
 0x376   : > { %v1797_v57 = vpop.f32.mrb[55].mxu1  ;;  %2047 = vmatmul.mubr.bf16.gmra.mrb[76].mxu1 %v1835_v49  ;;  %v1823_v60 = vmax.f32 %v1793_v53, 0.0 }
 0x377   : > { %v1824_v59 = vmax.f32 %v1795_v55, 0.0 }
 0x378   : > { %v1837_v62 = vpack.c.bf16 %v1823_v60, %v1823_v60 }
 0x379   : > { %v1838_v61 = vpack.c.bf16 %v1824_v59, %v1824_v59 }
 0x37b   : > { %2054 = vmatprep.mubr.bf16.mxu1 %v1838_v61 }
 0x37e   : > { %2055 = vmatmul.mubr.bf16.gmra.mrb[80].mxu1 %v1837_v62 }
 0x421   : > { %v2759_v1 = vpop.f32.mrb[56].mxu1 }
 0x422   : > { %v2760_v36 = vpop.f32.mrb[57].mxu1 }
 0x423   : > { %v2761_v2 = vadd.f32 %v2760_v36, %v2759_v1  ;;  %v2762_v3 = vpop.f32.mrb[58].mxu1 }
 0x424   : > { %v2763_v4 = vpop.f32.mrb[59].mxu1 }
 0x425   : > { %v3869_v5 = vadd.f32 %v2761_v2, %v3866_v40  ;;  %v2764_v7 = vadd.f32 %v2763_v4, %v2762_v3 }
 0x427   : > { %2062 = vadd.xlane.f32.xlu0 %v3869_v5  ;;  %v3873_v8 = vadd.f32 %v2764_v7, %v3866_v40 }
 0x429   : > { %v2765_v15 = vpop.f32.mrb[60].mxu1 }
 0x42a   : > { %v2766_v9 = vpop.f32.mrb[61].mxu1 }
 0x42b   : > { %v2767_v12 = vadd.f32 %v2766_v9, %v2765_v15  ;;  %v2768_v13 = vpop.f32.mrb[62].mxu1  ;;  %2064 = vadd.xlane.f32.xlu0 %v3873_v8 }
 0x42c   : > { %v2769_v14 = vpop.f32.mrb[63].mxu1 }
 0x42d   : > { %v3877_v18 = vadd.f32 %v2767_v12, %v3866_v40  ;;  %v2770_v17 = vadd.f32 %v2769_v14, %v2768_v13 }
 0x42f   : > { %2066 = vadd.xlane.f32.xlu1 %v3877_v18  ;;  %v3881_v19 = vadd.f32 %v2770_v17, %v3866_v40 }
 0x431   : > { %v2771_v21 = vpop.f32.mrb[64].mxu1 }
 0x432   : > { %v2772_v22 = vpop.f32.mrb[65].mxu1 }
 0x433   : > { %v2773_v23 = vadd.f32 %v2772_v22, %v2771_v21  ;;  %v2774_v24 = vpop.f32.mrb[66].mxu1  ;;  %2068 = vadd.xlane.f32.xlu1 %v3881_v19 }
 0x434   : > { %v2775_v25 = vpop.f32.mrb[67].mxu1 }
 0x435   : > { %v3885_v27 = vadd.f32 %v2773_v23, %v3866_v40  ;;  %v2776_v28 = vadd.f32 %v2775_v25, %v2774_v24 }
 0x437   : > { %v3888_v29 = vadd.f32 %v2776_v28, %v3866_v40  ;;  %2070 = vadd.xlane.f32.xlu0 %v3885_v27 }
 0x439   : > { %v2777_v32 = vpop.f32.mrb[68].mxu1  ;;  %2072 = vadd.xlane.f32.xlu1 %v3888_v29 }
 0x43a   : > { %v2778_v33 = vpop.f32.mrb[69].mxu1 }
 0x43b   : > { %v2779_v34 = vadd.f32 %v2778_v33, %v2777_v32  ;;  %v2780_v35 = vpop.f32.mrb[70].mxu1 }
 0x43c   : > { %v2781_v20 = vpop.f32.mrb[71].mxu1 }
 0x43d   : > { %v3893_v39 = vadd.f32 %v2779_v34, %v3866_v40  ;;  %v2782_v0 = vadd.f32 %v2781_v20, %v2780_v35 }
 0x43f   : > { %v3896_v58 = vadd.f32 %v2782_v0, %v3866_v40  ;;  %2074 = vadd.xlane.f32.xlu0 %v3893_v39 }
 0x441   : > { %v2783_v37 = vpop.f32.mrb[72].mxu1  ;;  %2076 = vadd.xlane.f32.xlu1 %v3896_v58 }
 0x442   : > { %v2784_v51 = vpop.f32.mrb[73].mxu1 }
 0x443   : > { %v2785_v31 = vadd.f32 %v2784_v51, %v2783_v37  ;;  %v2786_v30 = vpop.f32.mrb[74].mxu1 }
 0x444   : > { %v2787_v26 = vpop.f32.mrb[75].mxu1 }
 0x445   : > { %v3901_v38 = vadd.f32 %v2785_v31, %v3866_v40  ;;  %v2788_v6 = vadd.f32 %v2787_v26, %v2786_v30 }
 0x447   : > { %v3904_v16 = vadd.f32 %v2788_v6, %v3866_v40  ;;  %2078 = vadd.xlane.f32.xlu0 %v3901_v38 }
 0x449   : > { %v2789_v41 = vpop.f32.mrb[76].mxu1  ;;  %2080 = vadd.xlane.f32.xlu1 %v3904_v16 }
 0x44a   : > { %v2790_v10 = vpop.f32.mrb[77].mxu1 }
 0x44b   : > { %v2791_v42 = vadd.f32 %v2790_v10, %v2789_v41  ;;  %v2792_v43 = vpop.f32.mrb[78].mxu1 }
 0x44c   : > { %v2793_v11 = vpop.f32.mrb[79].mxu1 }
 0x44d   : > { %v3909_v44 = vadd.f32 %v2791_v42, %v3866_v40  ;;  %v2794_v45 = vadd.f32 %v2793_v11, %v2792_v43 }
 0x44f   : > { %v3912_v46 = vadd.f32 %v2794_v45, %v3866_v40  ;;  %2082 = vadd.xlane.f32.xlu0 %v3909_v44 }
 0x451   : > { %v2795_v47 = vpop.f32.mrb[80].mxu1  ;;  %2084 = vadd.xlane.f32.xlu1 %v3912_v46 }
 0x452   : > { %v2796_v48 = vpop.f32.mrb[81].mxu1 }
 0x453   : > { %v2797_v49 = vadd.f32 %v2796_v48, %v2795_v47  ;;  %v2798_v50 = vpop.f32.mrb[82].mxu1 }
 0x454   : > { %v2799_v52 = vpop.f32.mrb[83].mxu1 }
 0x455   : > { %v3917_v53 = vadd.f32 %v2797_v49, %v3866_v40 }
 0x457   : > { %2086 = vadd.xlane.f32.xlu0 %v3917_v53 }
 0x462   : > { %2116 = vperm.xlu1 %3000, %v3869_v5  }
 0x466   : > { %2126 = vperm.xlu1 %3000, %v3877_v18  }
 0x46a   : > { %2131 = vperm.xlu1 %3000, %v3881_v19  }
 0x46d   : > { %2121 = vperm.xlu0 %3001, %v3873_v8  }
 0x46e   : > { %2136 = vperm.xlu1 %3000, %v3885_v27  }
 0x471   : > { %2166 = vperm.xlu0 %3001, %v3909_v44  }
 0x472   : > { %2141 = vperm.xlu1 %3000, %v3888_v29  }
 0x475   : > { %2176 = vperm.xlu0 %3001, %v3917_v53  }
 0x476   : > { %2146 = vperm.xlu1 %3000, %v3893_v39  }
 0x47a   : > { %2151 = vperm.xlu1 %3000, %v3896_v58  }
 0x47e   : > { %2156 = vperm.xlu1 %3000, %v3901_v38  }
 0x482   : > { %2161 = vperm.xlu1 %3000, %v3904_v16  }
 0x486   : > { %2171 = vperm.xlu1 %3000, %v3912_v46  }
 0x4b4   : > { %v2063_v54 = vpop.xlane.xlu0 %2062 }
 0x4b5   : > { %v2088_v55 = vsub.f32 %v2063_v54, %v3869_v5 }
 0x4b7   : > { %v2101_v56 = vmul.f32 0.125, %v2088_v55 }
 0x4b8   : > { %v2065_v57 = vpop.xlane.xlu0 %2064 }
 0x4b9   : > { %v2089_v59 = vsub.f32 %v2065_v57, %v3873_v8  ;;  %2194 = vperm.xlu1 %3000, %v2101_v56  }
 0x4bb   : > { %v2102_v60 = vmul.f32 0.125, %v2089_v59 }
 0x4bc   : > { %v2067_v61 = vpop.xlane.xlu1 %2066 }
 0x4bd   : > { %v2090_v62 = vsub.f32 %v2067_v61, %v3877_v18  ;;  %2199 = vperm.xlu0 %3001, %v2102_v60  }
 0x4bf   : > { %v2103_v63 = vmul.f32 0.125, %v2090_v62 }
 0x4c0   : > { %v2069_v1 = vpop.xlane.xlu1 %2068 }
 0x4c1   : > { %v2091_v40 = vsub.f32 %v2069_v1, %v3881_v19  ;;  %2204 = vperm.xlu1 %3000, %v2103_v63  }
 0x4c3   : > { %v2104_v36 = vmul.f32 0.125, %v2091_v40 }
 0x4c4   : > { %v2071_v2 = vpop.xlane.xlu0 %2070 }
 0x4c5   : > { %v2092_v3 = vsub.f32 %v2071_v2, %v3885_v27  ;;  %2209 = vperm.xlu0 %3001, %v2104_v36  }
 0x4c6   : > { %v2073_v4 = vpop.xlane.xlu1 %2072 }
 0x4c7   : > { %v2105_v7 = vmul.f32 0.125, %v2092_v3  ;;  %v2093_v15 = vsub.f32 %v2073_v4, %v3888_v29 }
 0x4c9   : > { %v2106_v9 = vmul.f32 0.125, %v2093_v15  ;;  %2214 = vperm.xlu1 %3000, %v2105_v7  }
 0x4cb   : > { %2219 = vperm.xlu0 %3001, %v2106_v9  }
 0x4cc   : > { %v2075_v12 = vpop.xlane.xlu0 %2074 }
 0x4cd   : > { %v2094_v13 = vsub.f32 %v2075_v12, %v3893_v39 }
 0x4ce   : > { %v2077_v14 = vpop.xlane.xlu1 %2076 }
 0x4cf   : > { %v2107_v17 = vmul.f32 0.125, %v2094_v13  ;;  %v2095_v21 = vsub.f32 %v2077_v14, %v3896_v58 }
 0x4d1   : > { %v2108_v22 = vmul.f32 0.125, %v2095_v21  ;;  %2224 = vperm.xlu1 %3000, %v2107_v17  }
 0x4d3   : > { %2229 = vperm.xlu0 %3001, %v2108_v22  }
 0x4d4   : > { %v2079_v23 = vpop.xlane.xlu0 %2078 }
 0x4d5   : > { %v2096_v24 = vsub.f32 %v2079_v23, %v3901_v38 }
 0x4d6   : > { %v2081_v25 = vpop.xlane.xlu1 %2080 }
 0x4d7   : > { %v2109_v28 = vmul.f32 0.125, %v2096_v24  ;;  %v2097_v32 = vsub.f32 %v2081_v25, %v3904_v16 }
 0x4d9   : > { %v2110_v33 = vmul.f32 0.125, %v2097_v32  ;;  %2234 = vperm.xlu1 %3000, %v2109_v28  }
 0x4db   : > { %2239 = vperm.xlu0 %3001, %v2110_v33  }
 0x4dc   : > { %v2083_v34 = vpop.xlane.xlu0 %2082 }
 0x4dd   : > { %v2098_v35 = vsub.f32 %v2083_v34, %v3909_v44 }
 0x4de   : > { %v2085_v20 = vpop.xlane.xlu1 %2084 }
 0x4df   : > { %v2111_v0 = vmul.f32 0.125, %v2098_v35  ;;  %v2099_v37 = vsub.f32 %v2085_v20, %v3912_v46 }
 0x4e1   : > { %v2112_v51 = vmul.f32 0.125, %v2099_v37  ;;  %2244 = vperm.xlu1 %3000, %v2111_v0  }
 0x4e2   : > { %v2117_v6 = vpop.permute.xlu1 %2116 }
 0x4e3   : > { %2249 = vperm.xlu0 %3001, %v2112_v51   ;;  %v2179_v54 = vadd.f32 %v2117_v6, %v3869_v5 }
 0x4e4   : > { %v2087_v31 = vpop.xlane.xlu0 %2086 }
 0x4e5   : > { %v2100_v30 = vsub.f32 %v2087_v31, %v3917_v53 }
 0x4e6   : > { %v2127_v41 = vpop.permute.xlu1 %2126 }
 0x4e7   : > { %v2113_v26 = vmul.f32 0.125, %v2100_v30  ;;  %v2181_v62 = vadd.f32 %v2127_v41, %v3877_v18 }
 0x4e9   : > { %2254 = vperm.xlu1 %3000, %v2113_v26  }
 0x4ea   : > { %v2132_v10 = vpop.permute.xlu1 %2131 }
 0x4ec   : > { %v2122_v48 = vpop.permute.xlu0 %2121 }
 0x4ed   : > { %v2180_v59 = vadd.f32 %v2122_v48, %v3873_v8  ;;  %v2182_v8 = vadd.f32 %v2132_v10, %v3881_v19 }
 0x4ee   : > { %v2137_v42 = vpop.permute.xlu1 %2136 }
 0x4ef   : > { %v2183_v36 = vadd.f32 %v2137_v42, %v3885_v27 }
 0x4f0   : > { %v2167_v50 = vpop.permute.xlu0 %2166 }
 0x4f1   : > { %v2189_v22 = vadd.f32 %v2167_v50, %v3909_v44 }
 0x4f2   : > { %v2142_v43 = vpop.permute.xlu1 %2141 }
 0x4f3   : > { %v2184_v18 = vadd.f32 %v2142_v43, %v3888_v29 }
 0x4f4   : > { %v2177_v55 = vpop.permute.xlu0 %2176 }
 0x4f6   : > { %v2147_v11 = vpop.permute.xlu1 %2146 }
 0x4f7   : > { %v2185_v19 = vadd.f32 %v2147_v11, %v3893_v39 }
 0x4fa   : > { %v2152_v45 = vpop.permute.xlu1 %2151 }
 0x4fb   : > { %v2186_v27 = vadd.f32 %v2152_v45, %v3896_v58 }
 0x4fe   : > { %v2157_v47 = vpop.permute.xlu1 %2156 }
 0x4ff   : > { %v2187_v13 = vadd.f32 %v2157_v47, %v3901_v38 }
 0x502   : > { %v2162_v49 = vpop.permute.xlu1 %2161 }
 0x503   : > { %v2188_v17 = vadd.f32 %v2162_v49, %v3904_v16  ;;  %v2191_v16 = vadd.f32 %v2177_v55, %v3917_v53 }
 0x506   : > { %v2172_v52 = vpop.permute.xlu1 %2171 }
 0x507   : > { %v2190_v24 = vadd.f32 %v2172_v52, %v3912_v46 }
 0x538   : > { %v2195_v56 = vpop.permute.xlu1 %2194 }
 0x539   : > { %v2257_v57 = vsub.f32 %v2179_v54, %v2195_v56 }
 0x53b   : > { %2271 = vst.msk [vmem:[%s3949_s3] sm:$0xff] %vm2270_vm1, %v2257_v57 }
 0x53c   : > { %v2200_v60 = vpop.permute.xlu0 %2199 }
 0x53d   : > { %v2258_v61 = vsub.f32 %v2180_v59, %v2200_v60 }
 0x53f   : > { %2272 = vst.msk [vmem:[%s3949_s3 + $0x8] sm:$0xff] %vm2270_vm1, %v2258_v61 }
 0x540   : > { %v2205_v5 = vpop.permute.xlu1 %2204 }
 0x541   : > { %v2259_v63 = vsub.f32 %v2181_v62, %v2205_v5 }
 0x543   : > { %2273 = vst.msk [vmem:[%s3949_s3 + $0x10] sm:$0xff] %vm2270_vm1, %v2259_v63 }
 0x544   : > { %v2210_v1 = vpop.permute.xlu0 %2209 }
 0x545   : > { %v2260_v40 = vsub.f32 %v2182_v8, %v2210_v1 }
 0x547   : > { %2274 = vst.msk [vmem:[%s3949_s3 + $0x18] sm:$0xff] %vm2270_vm1, %v2260_v40 }
 0x548   : > { %v2215_v2 = vpop.permute.xlu1 %2214 }
 0x549   : > { %v2261_v3 = vsub.f32 %v2183_v36, %v2215_v2 }
 0x54a   : > { %v2220_v4 = vpop.permute.xlu0 %2219 }
 0x54b   : > { %2275 = vst.msk [vmem:[%s3949_s3 + $0x20] sm:$0xff] %vm2270_vm1, %v2261_v3  ;;  %v2262_v7 = vsub.f32 %v2184_v18, %v2220_v4 }
 0x54d   : > { %2276 = vst.msk [vmem:[%s3949_s3 + $0x28] sm:$0xff] %vm2270_vm1, %v2262_v7 }
 0x550   : > { %v2225_v15 = vpop.permute.xlu1 %2224 }
 0x551   : > { %v2263_v9 = vsub.f32 %v2185_v19, %v2225_v15 }
 0x552   : > { %v2230_v12 = vpop.permute.xlu0 %2229 }
 0x553   : > { %2277 = vst.msk [vmem:[%s3949_s3 + $0x30] sm:$0xff] %vm2270_vm1, %v2263_v9  ;;  %v2264_v29 = vsub.f32 %v2186_v27, %v2230_v12 }
 0x555   : > { %2278 = vst.msk [vmem:[%s3949_s3 + $0x38] sm:$0xff] %vm2270_vm1, %v2264_v29 }
 0x558   : > { %v2235_v14 = vpop.permute.xlu1 %2234 }
 0x559   : > { %v2265_v21 = vsub.f32 %v2187_v13, %v2235_v14 }
 0x55a   : > { %v2240_v39 = vpop.permute.xlu0 %2239 }
 0x55b   : > { %2279 = vst.msk [vmem:[%s3949_s3 + $0x40] sm:$0xff] %vm2270_vm1, %v2265_v21  ;;  %v2266_v58 = vsub.f32 %v2188_v17, %v2240_v39 }
 0x55d   : > { %2280 = vst.msk [vmem:[%s3949_s3 + $0x48] sm:$0xff] %vm2270_vm1, %v2266_v58 }
 0x560   : > { %v2245_v23 = vpop.permute.xlu1 %2244 }
 0x561   : > { %v2267_v25 = vsub.f32 %v2189_v22, %v2245_v23 }
 0x562   : > { %v2250_v28 = vpop.permute.xlu0 %2249 }
 0x563   : > { %2281 = vst.msk [vmem:[%s3949_s3 + $0x50] sm:$0xff] %vm2270_vm1, %v2267_v25  ;;  %v2268_v38 = vsub.f32 %v2190_v24, %v2250_v28 }
 0x565   : > { %2282 = vst.msk [vmem:[%s3949_s3 + $0x58] sm:$0xff] %vm2270_vm1, %v2268_v38  ;;  %2290 = sbr.rel (!%p4101_p12) target bundleno = 1449 (0x5a9), region = 72 }
 0x568   : > { %v2255_v32 = vpop.permute.xlu1 %2254 }
 0x569   : > { %v2269_v33 = vsub.f32 %v2191_v16, %v2255_v32 }
 0x56b   : > { %2283 = vst.msk [vmem:[%s3949_s3 + $0x60] sm:$0xff] %vm2270_vm1, %v2269_v33 }
 0x56c   : > { %s4110_s30 = smov (!%p2293_p13, %s2292_s30), 13 }
 0x56d   : > { %s2730_s26 = sshll.u32 %s4110_s30, 7 }
 0x56e   : > { %p2733_p0 = scmp.eq.s32.totalorder %s2730_s26, 0 }
 0x56f   : > { %3162 = sdivrem.u32 (!%p2733_p0), %s4110_s30, 13 }
 0x570   : > { %2301 = sbr.rel (%p2733_p0) target bundleno = 1449 (0x5a9), region = 76 }
 0x578   : > { %s4001_s17 = spop.drf %3162 }
 0x579   : > { %p2734_p1 = scmp.le.s32.totalorder %s4001_s17, 0 }
 0x57a   : > { %s4102_s12 = smov (!%p2734_p1), %s3995_s25  ;;  %s4103_s21 = smov (!%p2734_p1), %s3949_s3 }
 0x57b   : > { %2509 = sbr.rel (%p2734_p1) target bundleno = 1420 (0x58c), region = 153  ;;  %s4010_s27 = smov (!%p2734_p1), 0  }
 0x57c   : > { %s4012_s28 = smov (!%p2734_p1), 0  }
 0x582 LB: >> { %v2389_v44 = vld [vmem:[%s3320_s21] sm:$0xff]  ;;  %v2391_v46 = vld [vmem:[%s3320_s21 + $0x8] sm:$0xff]  ;;  %v2393_v53 = vld [vmem:[%s3320_s21 + $0x10] sm:$0xff]  ;;  %s2415_s11 = sadd.s32 1, %s3324_s27  ;;  %s2383_s28 = sadd.s32 1, %s3328_s28   ;;  %s3328_s28 = sphi %s4012_s28, %s2383_s28   ;;  %s3324_s27 = sphi %s4010_s27, %s4104_s27   ;;  %s3320_s21 = sphi %s4103_s21, %s2420_s21   ;;  %s3316_s12 = sphi %s4102_s12, %s2421_s12  }
 0x583   : >> { %2390 = vst [vmem:[%s3316_s12] sm:$0xff] %v2389_v44  ;;  %2392 = vst [vmem:[%s3316_s12 + $0x8] sm:$0xff] %v2391_v46  ;;  %v2395_v34 = vld [vmem:[%s3320_s21 + $0x18] sm:$0xff]  ;;  %v2397_v35 = vld [vmem:[%s3320_s21 + $0x20] sm:$0xff]  ;;  %p2416_p2 = scmp.ge.s32.totalorder %s2415_s11, %s4001_s17  ;;  %p2382_p3 = scmp.ge.s32.totalorder %s2383_s28, %s4001_s17 }
 0x584   : >> { %2394 = vst [vmem:[%s3316_s12 + $0x10] sm:$0xff] %v2393_v53  ;;  %v2399_v20 = vld [vmem:[%s3320_s21 + $0x28] sm:$0xff]  ;;  %2396 = vst [vmem:[%s3316_s12 + $0x18] sm:$0xff] %v2395_v34  ;;  %v2401_v0 = vld [vmem:[%s3320_s21 + $0x30] sm:$0xff] }
 0x585   : >> { %2398 = vst [vmem:[%s3316_s12 + $0x20] sm:$0xff] %v2397_v35  ;;  %2400 = vst [vmem:[%s3316_s12 + $0x28] sm:$0xff] %v2399_v20  ;;  %v2403_v37 = vld [vmem:[%s3320_s21 + $0x38] sm:$0xff]  ;;  %v2405_v51 = vld [vmem:[%s3320_s21 + $0x40] sm:$0xff]  ;;  %s4112_s11 = smov (%p2416_p2, %s2415_s11), 0  ;;  %2385 = sbr.rel (!%p2382_p3) target bundleno = 1410 (0x582), region = 159 }
 0x586   : >> { %2402 = vst [vmem:[%s3316_s12 + $0x30] sm:$0xff] %v2401_v0  ;;  %2404 = vst [vmem:[%s3316_s12 + $0x38] sm:$0xff] %v2403_v37  ;;  %v2407_v31 = vld [vmem:[%s3320_s21 + $0x48] sm:$0xff]  ;;  %v2409_v30 = vld [vmem:[%s3320_s21 + $0x50] sm:$0xff]  ;;  %s2418_s14 = smul.u32 104, %s4112_s11  ;;  %s4104_s27 = smov %s4112_s11 }
 0x587   : >> { %2406 = vst [vmem:[%s3316_s12 + $0x40] sm:$0xff] %v2405_v51  ;;  %v2411_v26 = vld [vmem:[%s3320_s21 + $0x58] sm:$0xff]  ;;  %2408 = vst [vmem:[%s3316_s12 + $0x48] sm:$0xff] %v2407_v31  ;;  %v2413_v6 = vld [vmem:[%s3320_s21 + $0x60] sm:$0xff] }
 0x588   : >> { %2410 = vst [vmem:[%s3316_s12 + $0x50] sm:$0xff] %v2409_v30  ;;  %2412 = vst [vmem:[%s3316_s12 + $0x58] sm:$0xff] %v2411_v26  ;;  %s2420_s21 = scalar_lea.vmem %s3949_s3, %s2418_s14 [#allocation7]  }
 0x589   : >> { %2414 = vst [vmem:[%s3316_s12 + $0x60] sm:$0xff] %v2413_v6  ;;  %s2421_s12 = scalar_lea.vmem %s3995_s25, %s2418_s14  }
 0x58c PF: > { %3164 = sdivrem.u32 %s4110_s30, 13 }
 0x58d   : > { %s2735_s15 = smul.u32 104, %s4001_s17 }
 0x58f   : > { %s2426_s20 = scalar_lea.vmem %s3949_s3, %s2735_s15 [#allocation7]   ;;  %s2428_s23 = scalar_lea.vmem %s3995_s25, %s2735_s15  }
 0x595   : > { %s3165_s19 = spop.drf %3164 }
 0x596   : > { %p2737_p5 = scmp.le.s32.totalorder %s3165_s19, 0 }
 0x597   : > { %s3330_s16 = smov (!%p2737_p5), %s2428_s23   ;;  %s3334_s22 = smov (!%p2737_p5), %s2426_s20  }
 0x598   : > { %2523 = sbr.rel (%p2737_p5) target bundleno = 1449 (0x5a9), region = 164  ;;  %s3338_s18 = smov (!%p2737_p5), 0  }
 0x599   : > { %s3342_s29 = smov (!%p2737_p5), 0  }
 0x59f LB: >> { %v2438_v41 = vld [vmem:[%s3336_s22] sm:$0xff]  ;;  %s2440_s24 = sadd.s32 1, %s3340_s18  ;;  %s2432_s29 = sadd.s32 1, %s3344_s29   ;;  %s3344_s29 = sphi %s3342_s29, %s2432_s29   ;;  %s3340_s18 = sphi %s3338_s18, %s3339_s18   ;;  %s3336_s22 = sphi %s3334_s22, %s2445_s22   ;;  %s3332_s16 = sphi %s3330_s16, %s2446_s16  }
 0x5a0   : >> { %2439 = vst [vmem:[%s3332_s16] sm:$0xff] %v2438_v41  ;;  %p2441_p8 = scmp.ge.s32.totalorder %s2440_s24, %s3165_s19  ;;  %p2431_p10 = scmp.ge.s32.totalorder %s2432_s29, %s3165_s19 }
 0x5a2   : >> { %s4114_s24 = smov (%p2441_p8, %s2440_s24), 0  ;;  %2434 = sbr.rel (!%p2431_p10) target bundleno = 1439 (0x59f), region = 170 }
 0x5a3   : >> { %s2738_s3 = sshll.u32 %s4114_s24, 3  ;;  %s3339_s18 = smov %s4114_s24  }
 0x5a4   : >> { %s2445_s22 = scalar_lea.vmem %s2426_s20, %s2738_s3 [#allocation7]   ;;  %s2446_s16 = scalar_lea.vmem %s2428_s23, %s2738_s3  }
 0x5a9 PF: > { %s4105_s25 = sld [smem:[#allocation10_spill]]  ;;  %p18_p4 = scmp.ge.s32.totalorder %s3422_s13, 4  }
 0x5aa   : > { %s4106_s30 = smov %s3308_s10  ;;  %s4108_s11 = smov %s3422_s13 }
 0x5ab   :  { %20 = sbr.rel (!%p18_p4) target bundleno = 5 (0x5), region = 181 }
 0x5af   : > { %s4107_s10 = smov %s4105_s25 }
 0x5b2   :  { %2462 = vsyncpa [#allocation3], 1 }
 0x5b3   :  { %2464 = vsyncpa [#allocation3 + $0x1], 1 }
 0x5b4   :  { %2465 = vsyncpa [#allocation5], 1 }

</bundles_post_ra>
